<compile_context>
chip_gen: v7x
topology: tpu7x:2x2x1
jax: 0.10.0
libtpu: 0.0.40
codegen_flags: <defaults>
</compile_context>

<pallas_src>
import functools
import math

import jax
import jax.numpy as jnp
from jax.experimental import pallas as pl
from jax.experimental.pallas import tpu as pltpu


# ----------------------------------------------------------------------------
# Small helpers used inside kernels
# ----------------------------------------------------------------------------

def _prenorm(x, g, b):
    """LayerNorm in f32.  x: (S, d), g/b: (1, d)."""
    mu = jnp.mean(x, axis=-1, keepdims=True)
    var = jnp.mean(jnp.square(x - mu), axis=-1, keepdims=True)
    return (x - mu) * jax.lax.rsqrt(var + 1e-5) * g + b


def _rot_half_matrix(dh):
    """Constant (dh, dh) matrix R with t @ R == concat([-t2, t1], -1).

    Expressing rotate-half as a tiny MXU matmul avoids in-kernel lane shuffles.
    """
    p = jax.lax.broadcasted_iota(jnp.int32, (dh, dh), 0)
    j = jax.lax.broadcasted_iota(jnp.int32, (dh, dh), 1)
    half = dh // 2
    return (jnp.where(p == j + half, -1.0, 0.0)
            + jnp.where(p + half == j, 1.0, 0.0)).astype(jnp.float32)


def _mha_heads(q_all, k_x, v_x, k_s, v_s, cos, sin, wo, bo,
               *, h, dh, window, scale):
    """Multi-head attention core on already-projected Q/K/V values.

    q_all: (S, h*dh); k_x/v_x: (S, h*dh) in-block keys/values (rotary applied);
    k_s/v_s: optional (ns, h*dh) recurrent-state keys/values (no rotary, always
    visible).  Returns the output projection (S, d) including bias.
    """
    S = q_all.shape[0]
    d_out = wo.shape[1]
    R = _rot_half_matrix(dh)

    # In-kernel additive sliding-window causal mask (no HBM traffic).
    qi = jax.lax.broadcasted_iota(jnp.int32, (S, S), 0)
    kj = jax.lax.broadcasted_iota(jnp.int32, (S, S), 1)
    allowed = (kj <= qi) & ((qi - kj) < window)
    bias = jnp.where(allowed, 0.0, -1e9).astype(jnp.float32)

    def rope(t):
        return t * cos + jnp.dot(t, R, preferred_element_type=jnp.float32) * sin

    acc = jnp.zeros((S, d_out), jnp.float32)
    for head in range(h):
        sl = slice(head * dh, (head + 1) * dh)
        qh = rope(q_all[:, sl]) * scale                 # pre-scaled queries
        kh = rope(k_x[:, sl])
        vh = v_x[:, sl]
        # Contract head_dim directly (no k transpose materialized).
        s_x = jax.lax.dot_general(qh, kh, (((1,), (1,)), ((), ())),
                                  preferred_element_type=jnp.float32) + bias
        if k_s is None:
            m = jnp.max(s_x, axis=-1, keepdims=True)
            p_x = jnp.exp(s_x - m)
            denom = jnp.sum(p_x, axis=-1, keepdims=True)
            oh = jnp.dot(p_x, vh, preferred_element_type=jnp.float32)
        else:
            khs = k_s[:, sl]
            vhs = v_s[:, sl]
            s_s = jax.lax.dot_general(qh, khs, (((1,), (1,)), ((), ())),
                                      preferred_element_type=jnp.float32)
            m = jnp.maximum(jnp.max(s_x, axis=-1, keepdims=True),
                            jnp.max(s_s, axis=-1, keepdims=True))
            p_x = jnp.exp(s_x - m)
            p_s = jnp.exp(s_s - m)
            denom = (jnp.sum(p_x, axis=-1, keepdims=True)
                     + jnp.sum(p_s, axis=-1, keepdims=True))
            oh = (jnp.dot(p_x, vh, preferred_element_type=jnp.float32)
                  + jnp.dot(p_s, vhs, preferred_element_type=jnp.float32))
        oh = oh * pl.reciprocal(denom, approx=True)      # EUP slot, free-ish
        # Fold the head merge into the output projection (per-head row slice).
        acc = acc + jnp.dot(oh, wo[sl, :], preferred_element_type=jnp.float32)
    return acc + bo


# ----------------------------------------------------------------------------
# Fused attention-block kernels (LN + QKV + rotary + attention + Wo + residual)
# ----------------------------------------------------------------------------

def _attn_block_kernel(x_ref, g_ref, b_ref, wqkv_ref, bqkv_ref, wo_ref, bo_ref,
                       cos_ref, sin_ref, o_ref, *, h, dh, window, scale):
    x = x_ref[0].astype(jnp.float32)                     # (S, d)
    xn = _prenorm(x, g_ref[...], b_ref[...])
    hdh = h * dh
    w_all = wqkv_ref[...]
    b_all = bqkv_ref[...]
    qkv = jnp.dot(xn, w_all, preferred_element_type=jnp.float32) + b_all
    out = _mha_heads(qkv[:, :hdh], qkv[:, hdh:2 * hdh], qkv[:, 2 * hdh:],
                     None, None, cos_ref[...], sin_ref[...],
                     wo_ref[...], bo_ref[...],
                     h=h, dh=dh, window=window, scale=scale)
    o_ref[0] = (x + out).astype(o_ref.dtype)


def _attn_block_state_kernel(x_ref, g_ref, b_ref, wqkv_ref, bqkv_ref, wo_ref,
                             bo_ref, cos_ref, sin_ref, state_ref, o_ref,
                             *, h, dh, window, scale):
    x = x_ref[0].astype(jnp.float32)                     # (S, d)
    xn = _prenorm(x, g_ref[...], b_ref[...])
    hdh = h * dh
    w_all = wqkv_ref[...]
    b_all = bqkv_ref[...]
    q_all = (jnp.dot(xn, w_all[:, :hdh], preferred_element_type=jnp.float32)
             + b_all[:, :hdh])
    kv_x = (jnp.dot(xn, w_all[:, hdh:], preferred_element_type=jnp.float32)
            + b_all[:, hdh:])
    st = state_ref[...].astype(jnp.float32)              # (ns, d), not layernormed
    kv_s = (jnp.dot(st, w_all[:, hdh:], preferred_element_type=jnp.float32)
            + b_all[:, hdh:])
    out = _mha_heads(q_all, kv_x[:, :hdh], kv_x[:, hdh:],
                     kv_s[:, :hdh], kv_s[:, hdh:],
                     cos_ref[...], sin_ref[...], wo_ref[...], bo_ref[...],
                     h=h, dh=dh, window=window, scale=scale)
    o_ref[0] = (x + out).astype(o_ref.dtype)


def attn_block(x, p, cos, sin, h, dh, window, state=None):
    """One fused pre-LN MHA block with residual.  Grid over batch (parallel)."""
    B, S, d = x.shape
    hdh = h * dh
    scale = 1.0 / math.sqrt(dh)

    args = [x,
            p["ln1_g"].reshape(1, d), p["ln1_b"].reshape(1, d),
            p["wqkv"], p["bqkv"].reshape(1, 3 * hdh),
            p["wo"], p["bo"].reshape(1, d),
            cos, sin]
    specs = [
        pl.BlockSpec((1, S, d), lambda b: (b, 0, 0)),
        pl.BlockSpec((1, d), lambda b: (0, 0)),
        pl.BlockSpec((1, d), lambda b: (0, 0)),
        pl.BlockSpec((d, 3 * hdh), lambda b: (0, 0)),
        pl.BlockSpec((1, 3 * hdh), lambda b: (0, 0)),
        pl.BlockSpec((hdh, d), lambda b: (0, 0)),
        pl.BlockSpec((1, d), lambda b: (0, 0)),
        pl.BlockSpec((S, dh), lambda b: (0, 0)),
        pl.BlockSpec((S, dh), lambda b: (0, 0)),
    ]
    if state is None:
        kernel = functools.partial(_attn_block_kernel, h=h, dh=dh,
                                   window=window, scale=scale)
    else:
        ns = state.shape[0]
        args.append(state)
        specs.append(pl.BlockSpec((ns, d), lambda b: (0, 0)))
        kernel = functools.partial(_attn_block_state_kernel, h=h, dh=dh,
                                   window=window, scale=scale)

    # TODO(synk): for long sequences this kernel should additionally tile the
    # KV axis flash-style (online softmax) to bound VMEM on v7x (64 MiB).
    return pl.pallas_call(
        kernel,
        out_shape=jax.ShapeDtypeStruct((B, S, d), x.dtype),
        grid=(B,),
        in_specs=specs,
        out_specs=pl.BlockSpec((1, S, d), lambda b: (b, 0, 0)),
        compiler_params=pltpu.CompilerParams(
            dimension_semantics=("parallel",),
            vmem_limit_bytes=32 * 1024 * 1024),
    )(*args)


# ----------------------------------------------------------------------------
# Fused FFN-block kernel (LN + W1 + GELU + W2 + residual), tiled over rows
# ----------------------------------------------------------------------------

def _ffn_block_kernel(x_ref, g_ref, b_ref, w1_ref, b1_ref, w2_ref, b2_ref, o_ref):
    x = x_ref[...].astype(jnp.float32)                   # (tm, d)
    xn = _prenorm(x, g_ref[...], b_ref[...])
    h1 = jnp.dot(xn, w1_ref[...], preferred_element_type=jnp.float32) + b1_ref[...]
    h1 = jax.nn.gelu(h1)
    h2 = jnp.dot(h1, w2_ref[...], preferred_element_type=jnp.float32) + b2_ref[...]
    o_ref[...] = (x + h2).astype(o_ref.dtype)


def _pick_row_tile(M, target=256):
    # Partial trailing blocks along the row axis are safe (masked stores).
    return M if M <= target else target


def ffn_block(x, p):
    B, S, d = x.shape
    M = B * S
    F = p["w1"].shape[1]
    x2 = x.reshape(M, d)
    tm = _pick_row_tile(M)
    out = pl.pallas_call(
        _ffn_block_kernel,
        out_shape=jax.ShapeDtypeStruct((M, d), x.dtype),
        grid=(pl.cdiv(M, tm),),
        in_specs=[
            pl.BlockSpec((tm, d), lambda i: (i, 0)),
            pl.BlockSpec((1, d), lambda i: (0, 0)),
            pl.BlockSpec((1, d), lambda i: (0, 0)),
            pl.BlockSpec((d, F), lambda i: (0, 0)),
            pl.BlockSpec((1, F), lambda i: (0, 0)),
            pl.BlockSpec((F, d), lambda i: (0, 0)),
            pl.BlockSpec((1, d), lambda i: (0, 0)),
        ],
        out_specs=pl.BlockSpec((tm, d), lambda i: (i, 0)),
        compiler_params=pltpu.CompilerParams(
            dimension_semantics=("parallel",),
            vmem_limit_bytes=32 * 1024 * 1024),
    )(x2, p["ln2_g"].reshape(1, d), p["ln2_b"].reshape(1, d),
      p["w1"], p["b1"].reshape(1, F), p["w2"], p["b2"].reshape(1, d))
    return out.reshape(B, S, d)


# ----------------------------------------------------------------------------
# Tiled matmul + bias (vocab projection), K reduction with VMEM accumulator
# ----------------------------------------------------------------------------

def _matmul_bias_kernel(x_ref, w_ref, b_ref, o_ref, acc_ref):
    @pl.when(pl.program_id(2) == 0)
    def _():
        acc_ref[...] = jnp.zeros_like(acc_ref)

    acc_ref[...] += jnp.dot(x_ref[...], w_ref[...],
                            preferred_element_type=jnp.float32)

    @pl.when(pl.program_id(2) == pl.num_programs(2) - 1)
    def _():
        o_ref[...] = (acc_ref[...] + b_ref[...]).astype(o_ref.dtype)


def _pick_col_tile(N, target=512):
    return N if N <= target else target


def _pick_k_tile(K, target=512):
    if K <= target:
        return K
    for t in (target, 256, 128):
        if K % t == 0:
            return t
    # TODO(synk): very large K not divisible by 128 would need zero-padding.
    return K


def matmul_bias(x, w, b, *, tm=256, tn=512, tk=512):
    M, K = x.shape
    N = w.shape[1]
    tm = _pick_row_tile(M, tm)
    tn = _pick_col_tile(N, tn)
    tk = _pick_k_tile(K, tk)
    grid = (pl.cdiv(M, tm), pl.cdiv(N, tn), pl.cdiv(K, tk))
    return pl.pallas_call(
        _matmul_bias_kernel,
        out_shape=jax.ShapeDtypeStruct((M, N), x.dtype),
        grid=grid,
        in_specs=[
            pl.BlockSpec((tm, tk), lambda i, j, k: (i, k)),
            pl.BlockSpec((tk, tn), lambda i, j, k: (k, j)),
            pl.BlockSpec((1, tn), lambda i, j, k: (0, j)),
        ],
        out_specs=pl.BlockSpec((tm, tn), lambda i, j, k: (i, j)),
        scratch_shapes=[pltpu.VMEM((tm, tn), jnp.float32)],
        compiler_params=pltpu.CompilerParams(
            dimension_semantics=("parallel", "parallel", "arbitrary"),
            vmem_limit_bytes=32 * 1024 * 1024),
    )(x, w, b.reshape(1, N))


# ----------------------------------------------------------------------------
# Plain-JAX glue: rotary tables, parameter init, full forward pass
# ----------------------------------------------------------------------------

def rotary_tables(seq_len, dim):
    inv_freq = 1.0 / (10000.0 ** (jnp.arange(0, dim, 2, dtype=jnp.float32) / dim))
    t = jnp.arange(seq_len, dtype=jnp.float32)
    freqs = jnp.einsum("i,j->ij", t, inv_freq)            # (S, dim/2)
    freqs = jnp.concatenate([freqs, freqs], axis=-1)       # (S, dim)
    # TODO(synk): reference uses utils.RotaryEmbedding(head_dim*head_num) with
    # xpos scaling; standard per-head rotary of dim=head_dim is used here.
    return jnp.cos(freqs), jnp.sin(freqs)


def _dense(key, shape, scale=0.02):
    return scale * jax.random.normal(key, shape, dtype=jnp.float32)


def init_attn_params(key, d, h, dh):
    ks = jax.random.split(key, 2)
    hdh = h * dh
    return dict(
        ln1_g=jnp.ones((d,), jnp.float32), ln1_b=jnp.zeros((d,), jnp.float32),
        wqkv=_dense(ks[0], (d, 3 * hdh)), bqkv=jnp.zeros((3 * hdh,), jnp.float32),
        wo=_dense(ks[1], (hdh, d)), bo=jnp.zeros((d,), jnp.float32),
    )


def init_transformer_layer(key, d, d_ff, h, dh):
    k_attn, k1, k2 = jax.random.split(key, 3)
    p = init_attn_params(k_attn, d, h, dh)
    p.update(
        ln2_g=jnp.ones((d,), jnp.float32), ln2_b=jnp.zeros((d,), jnp.float32),
        w1=_dense(k1, (d, d_ff)), b1=jnp.zeros((d_ff,), jnp.float32),
        w2=_dense(k2, (d_ff, d)), b2=jnp.zeros((d,), jnp.float32),
    )
    return p


def init_params(key, cfg):
    d, h, dh = cfg["d_input"], cfg["head_num"], cfg["head_dim"]
    keys = jax.random.split(key, cfg["transformer_num"] + 5)
    layers_pre = [
        init_transformer_layer(keys[i], d, cfg["d_ff"], h, dh)
        for i in range(cfg["transformer_num"])
    ]
    k_br, k_brs, k_post, k_emb, k_out = keys[cfg["transformer_num"]:]
    block_recurrent = init_attn_params(k_br, d, h, dh)
    block_recurrent["init_state"] = _dense(k_brs, (cfg["state_num"], d), scale=0.02)
    layer_post = init_transformer_layer(k_post, d, cfg["d_ff"], h, dh)
    return dict(
        embed=_dense(k_emb, (cfg["word_num"], d), scale=1.0),
        layers_pre=layers_pre,
        block_recurrent=block_recurrent,
        layer_post=layer_post,
        w_out=_dense(k_out, (d, cfg["word_num"])),
        b_out=jnp.zeros((cfg["word_num"],), jnp.float32),
    )


def block_recurrent_transformer_forward(params, tokens, cfg):
    d, h, dh = cfg["d_input"], cfg["head_num"], cfg["head_dim"]
    window = cfg["window_size"]
    B, S = tokens.shape

    # Token-embedding gather stays in XLA (no clean block-wise Pallas equivalent
    # without a scalar-prefetch DMA gather).
    x = jnp.take(params["embed"], tokens, axis=0)          # (B, S, d)
    cos, sin = rotary_tables(S, dh)                        # (S, dh)

    # dropout = 0.0 -> identity (eval semantics); not emitted.
    for lp in params["layers_pre"]:
        x = attn_block(x, lp, cos, sin, h, dh, window)
        x = ffn_block(x, lp)

    # Block-recurrent layer: keys/values include the learned state (always
    # visible, no rotary on state positions).
    brp = params["block_recurrent"]
    x = attn_block(x, brp, cos, sin, h, dh, window, state=brp["init_state"])
    # TODO(synk): the reference layer also emits an LSTM-gated next-state; with
    # seq_size == block_size (a single block) it never feeds the token output,
    # so the state update is omitted.

    lp = params["layer_post"]
    x = attn_block(x, lp, cos, sin, h, dh, window)
    x = ffn_block(x, lp)

    # Vocab projection keeps word_num as the (lane-dense) last dim inside the
    # kernel; the (B, word_num, S) transpose is done once at the boundary.
    logits = matmul_bias(x.reshape(B * S, d), params["w_out"], params["b_out"])
    logits = logits.reshape(B, S, -1)
    return jnp.transpose(logits, (0, 2, 1))                # (B, word_num, S)


# ----------------------------------------------------------------------------
# Demo
# ----------------------------------------------------------------------------

if __name__ == "__main__":
    cfg = dict(
        seq_size=8, block_size=8, window_size=8,
        d_input=32, d_ff=64, head_num=2, head_dim=16,
        state_num=4, dropout=0.0, transformer_num=1, word_num=50,
    )
    key = jax.random.PRNGKey(0)
    k_param, k_tok = jax.random.split(key)
    params = init_params(k_param, cfg)
    tokens = jax.random.randint(k_tok, (2, cfg["seq_size"]), 0, cfg["word_num"],
                                dtype=jnp.int32)

    fwd = jax.jit(functools.partial(block_recurrent_transformer_forward, cfg=cfg))
    out = fwd(params, tokens)
    out = jax.block_until_ready(out)

    assert out.shape == (2, cfg["word_num"], cfg["seq_size"]), out.shape
    assert out.dtype == jnp.float32
    assert bool(jnp.all(jnp.isfinite(out)))
    print("KERNEL_OK")
</pallas_src>

<mosaic_0001>
module attributes {stable_mosaic.version = 11 : i64} {
  func.func @_matmul_bias_kernel(%arg0: i32, %arg1: i32, %arg2: i32, %arg3: memref<16x32xf32, #tpu.memory_space<vmem>>, %arg4: memref<32x50xf32, #tpu.memory_space<vmem>>, %arg5: memref<1x50xf32, #tpu.memory_space<vmem>>, %arg6: memref<16x50xf32, #tpu.memory_space<vmem>>, %arg7: memref<16x50xf32, #tpu.memory_space<vmem>>) attributes {dimension_semantics = [#tpu.dimension_semantics<parallel>, #tpu.dimension_semantics<parallel>, #tpu.dimension_semantics<arbitrary>], iteration_bounds = array<i64: 1, 1, 1>, scalar_prefetch = 0 : i64, scratch_operands = 1 : i64, tpu.core_type = #tpu.core_type<tc>, window_params = [{transform_indices = @transform_0, window_bounds = array<i64: 16, 32>}, {transform_indices = @transform_1, window_bounds = array<i64: 32, 50>}, {transform_indices = @transform_2, window_bounds = array<i64: 1, 50>}, {transform_indices = @transform_3, window_bounds = array<i64: 16, 50>}]} {
    %c0_i32 = arith.constant 0 : i32
    %0 = arith.cmpi eq, %arg2, %c0_i32 : i32
    %1 = arith.extui %0 : i1 to i32
    %c0_i32_0 = arith.constant 0 : i32
    %2 = arith.cmpi ne, %1, %c0_i32_0 : i32
    scf.if %2 {
      %cst_10 = arith.constant 0.000000e+00 : f32
      %12 = vector.broadcast %cst_10 : f32 to vector<16x50xf32>
      %c0_11 = arith.constant 0 : index
      %c0_12 = arith.constant 0 : index
      %13 = vector.load %arg7[%c0_11, %c0_12] : memref<16x50xf32, #tpu.memory_space<vmem>>, vector<16x50xf32>
      tpu.vector_store %arg7[%c0_11, %c0_12], %12 {strides = array<i32>} : memref<16x50xf32, #tpu.memory_space<vmem>>, vector<16x50xf32>,
    } else {
    }
    %c0 = arith.constant 0 : index
    %c0_1 = arith.constant 0 : index
    %3 = vector.load %arg7[%c0, %c0_1] : memref<16x50xf32, #tpu.memory_space<vmem>>, vector<16x50xf32>
    %c0_2 = arith.constant 0 : index
    %c0_3 = arith.constant 0 : index
    %4 = vector.load %arg3[%c0_2, %c0_3] : memref<16x32xf32, #tpu.memory_space<vmem>>, vector<16x32xf32>
    %c0_4 = arith.constant 0 : index
    %c0_5 = arith.constant 0 : index
    %5 = vector.load %arg4[%c0_4, %c0_5] : memref<32x50xf32, #tpu.memory_space<vmem>>, vector<32x50xf32>
    %cst = arith.constant dense<0.000000e+00> : vector<16x50xf32>
    %6 = tpu.matmul %4, %5, %cst {dimension_numbers = #tpu.dot_dimension_numbers<[1], [0], [0], [1], [0, 0, 1, 1], [], []>} : vector<16x32xf32>, vector<32x50xf32>, vector<16x50xf32> -> vector<16x50xf32>
    %7 = arith.addf %3, %6 : vector<16x50xf32>
    %c0_6 = arith.constant 0 : index
    %c0_7 = arith.constant 0 : index
    %8 = vector.load %arg7[%c0_6, %c0_7] : memref<16x50xf32, #tpu.memory_space<vmem>>, vector<16x50xf32>
    tpu.vector_store %arg7[%c0_6, %c0_7], %7 {strides = array<i32>} : memref<16x50xf32, #tpu.memory_space<vmem>>, vector<16x50xf32>,
    %c0_i32_8 = arith.constant 0 : i32
    %9 = arith.cmpi eq, %arg2, %c0_i32_8 : i32
    %10 = arith.extui %9 : i1 to i32
    %c0_i32_9 = arith.constant 0 : i32
    %11 = arith.cmpi ne, %10, %c0_i32_9 : i32
    scf.if %11 {
      %c0_10 = arith.constant 0 : index
      %c0_11 = arith.constant 0 : index
      %12 = vector.load %arg7[%c0_10, %c0_11] : memref<16x50xf32, #tpu.memory_space<vmem>>, vector<16x50xf32>
      %c0_12 = arith.constant 0 : index
      %c0_13 = arith.constant 0 : index
      %13 = vector.load %arg5[%c0_12, %c0_13] : memref<1x50xf32, #tpu.memory_space<vmem>>, vector<1x50xf32>
      %14 = vector.broadcast %13 : vector<1x50xf32> to vector<16x50xf32>
      %15 = arith.addf %12, %14 : vector<16x50xf32>
      %c0_14 = arith.constant 0 : index
      %c0_15 = arith.constant 0 : index
      %16 = vector.load %arg6[%c0_14, %c0_15] : memref<16x50xf32, #tpu.memory_space<vmem>>, vector<16x50xf32>
      tpu.vector_store %arg6[%c0_14, %c0_15], %15 {strides = array<i32>} : memref<16x50xf32, #tpu.memory_space<vmem>>, vector<16x50xf32>,
    } else {
    }
    return
  }
  func.func @transform_0(%arg0: i32, %arg1: i32, %arg2: i32) -> (i32, i32) {
    %c0_i32 = arith.constant 0 : i32
    return %arg0, %arg2 : i32, i32
  }
  func.func @transform_1(%arg0: i32, %arg1: i32, %arg2: i32) -> (i32, i32) {
    %c0_i32 = arith.constant 0 : i32
    return %arg2, %arg1 : i32, i32
  }
  func.func @transform_2(%arg0: i32, %arg1: i32, %arg2: i32) -> (i32, i32) {
    %c0_i32 = arith.constant 0 : i32
    %c0_i32_0 = arith.constant 0 : i32
    return %c0_i32, %arg1 : i32, i32
  }
  func.func @transform_3(%arg0: i32, %arg1: i32, %arg2: i32) -> (i32, i32) {
    %c0_i32 = arith.constant 0 : i32
    return %arg0, %arg1 : i32, i32
  }
}

module attributes {stable_mosaic.version = 11 : i64} {
  func.func @_ffn_block_kernel(%arg0: i32, %arg1: memref<16x32xf32, #tpu.memory_space<vmem>>, %arg2: memref<1x32xf32, #tpu.memory_space<vmem>>, %arg3: memref<1x32xf32, #tpu.memory_space<vmem>>, %arg4: memref<32x64xf32, #tpu.memory_space<vmem>>, %arg5: memref<1x64xf32, #tpu.memory_space<vmem>>, %arg6: memref<64x32xf32, #tpu.memory_space<vmem>>, %arg7: memref<1x32xf32, #tpu.memory_space<vmem>>, %arg8: memref<16x32xf32, #tpu.memory_space<vmem>>) attributes {dimension_semantics = [#tpu.dimension_semantics<parallel>], iteration_bounds = array<i64: 1>, scalar_prefetch = 0 : i64, scratch_operands = 0 : i64, tpu.core_type = #tpu.core_type<tc>, window_params = [{transform_indices = @transform_0, window_bounds = array<i64: 16, 32>}, {pipeline_mode = #tpu.pipeline_mode<synchronous>, transform_indices = @transform_1, window_bounds = array<i64: 1, 32>}, {pipeline_mode = #tpu.pipeline_mode<synchronous>, transform_indices = @transform_2, window_bounds = array<i64: 1, 32>}, {pipeline_mode = #tpu.pipeline_mode<synchronous>, transform_indices = @transform_3, window_bounds = array<i64: 32, 64>}, {pipeline_mode = #tpu.pipeline_mode<synchronous>, transform_indices = @transform_4, window_bounds = array<i64: 1, 64>}, {pipeline_mode = #tpu.pipeline_mode<synchronous>, transform_indices = @transform_5, window_bounds = array<i64: 64, 32>}, {pipeline_mode = #tpu.pipeline_mode<synchronous>, transform_indices = @transform_6, window_bounds = array<i64: 1, 32>}, {transform_indices = @transform_7, window_bounds = array<i64: 16, 32>}]} {
    %c0 = arith.constant 0 : index
    %c0_0 = arith.constant 0 : index
    %0 = vector.load %arg1[%c0, %c0_0] : memref<16x32xf32, #tpu.memory_space<vmem>>, vector<16x32xf32>
    %c0_1 = arith.constant 0 : index
    %c0_2 = arith.constant 0 : index
    %1 = vector.load %arg2[%c0_1, %c0_2] : memref<1x32xf32, #tpu.memory_space<vmem>>, vector<1x32xf32>
    %c0_3 = arith.constant 0 : index
    %c0_4 = arith.constant 0 : index
    %2 = vector.load %arg3[%c0_3, %c0_4] : memref<1x32xf32, #tpu.memory_space<vmem>>, vector<1x32xf32>
    %cst = arith.constant dense<0.000000e+00> : vector<16xf32>
    %3 = vector.multi_reduction <add>, %0, %cst [1] : vector<16x32xf32> to vector<16xf32>
    %4 = vector.shape_cast %3 : vector<16xf32> to vector<16x1xf32>
    %cst_5 = arith.constant 3.200000e+01 : f32
    %5 = vector.broadcast %cst_5 : f32 to vector<16x1xf32>
    %6 = arith.divf %4, %5 : vector<16x1xf32>
    %7 = vector.broadcast %6 : vector<16x1xf32> to vector<16x32xf32>
    %8 = arith.subf %0, %7 : vector<16x32xf32>
    %9 = arith.mulf %8, %8 : vector<16x32xf32>
    %cst_6 = arith.constant dense<0.000000e+00> : vector<16xf32>
    %10 = vector.multi_reduction <add>, %9, %cst_6 [1] : vector<16x32xf32> to vector<16xf32>
    %11 = vector.shape_cast %10 : vector<16xf32> to vector<16x1xf32>
    %cst_7 = arith.constant 3.200000e+01 : f32
    %12 = vector.broadcast %cst_7 : f32 to vector<16x1xf32>
    %13 = arith.divf %11, %12 : vector<16x1xf32>
    %14 = vector.broadcast %6 : vector<16x1xf32> to vector<16x32xf32>
    %15 = arith.subf %0, %14 : vector<16x32xf32>
    %cst_8 = arith.constant 9.99999974E-6 : f32
    %16 = vector.broadcast %cst_8 : f32 to vector<16x1xf32>
    %17 = arith.addf %13, %16 : vector<16x1xf32>
    %18 = math.rsqrt %17 : vector<16x1xf32>
    %19 = vector.broadcast %18 : vector<16x1xf32> to vector<16x32xf32>
    %20 = arith.mulf %15, %19 : vector<16x32xf32>
    %21 = vector.broadcast %1 : vector<1x32xf32> to vector<16x32xf32>
    %22 = arith.mulf %20, %21 : vector<16x32xf32>
    %23 = vector.broadcast %2 : vector<1x32xf32> to vector<16x32xf32>
    %24 = arith.addf %22, %23 : vector<16x32xf32>
    %c0_9 = arith.constant 0 : index
    %c0_10 = arith.constant 0 : index
    %25 = vector.load %arg4[%c0_9, %c0_10] : memref<32x64xf32, #tpu.memory_space<vmem>>, vector<32x64xf32>
    %cst_11 = arith.constant dense<0.000000e+00> : vector<16x64xf32>
    %26 = tpu.matmul %24, %25, %cst_11 {dimension_numbers = #tpu.dot_dimension_numbers<[1], [0], [0], [1], [0, 0, 1, 1], [], []>} : vector<16x32xf32>, vector<32x64xf32>, vector<16x64xf32> -> vector<16x64xf32>
    %c0_12 = arith.constant 0 : index
    %c0_13 = arith.constant 0 : index
    %27 = vector.load %arg5[%c0_12, %c0_13] : memref<1x64xf32, #tpu.memory_space<vmem>>, vector<1x64xf32>
    %28 = vector.broadcast %27 : vector<1x64xf32> to vector<16x64xf32>
    %29 = arith.addf %26, %28 : vector<16x64xf32>
    %30 = arith.mulf %29, %29 : vector<16x64xf32>
    %31 = arith.mulf %29, %30 : vector<16x64xf32>
    %cst_14 = arith.constant 4.471500e-02 : f32
    %32 = vector.broadcast %cst_14 : f32 to vector<16x64xf32>
    %33 = arith.mulf %32, %31 : vector<16x64xf32>
    %34 = arith.addf %29, %33 : vector<16x64xf32>
    %cst_15 = arith.constant 0.797884583 : f32
    %35 = vector.broadcast %cst_15 : f32 to vector<16x64xf32>
    %36 = arith.mulf %35, %34 : vector<16x64xf32>
    %37 = math.tanh %36 : vector<16x64xf32>
    %cst_16 = arith.constant 1.000000e+00 : f32
    %38 = vector.broadcast %cst_16 : f32 to vector<16x64xf32>
    %39 = arith.addf %38, %37 : vector<16x64xf32>
    %cst_17 = arith.constant 5.000000e-01 : f32
    %40 = vector.broadcast %cst_17 : f32 to vector<16x64xf32>
    %41 = arith.mulf %40, %39 : vector<16x64xf32>
    %42 = arith.mulf %29, %41 : vector<16x64xf32>
    %c0_18 = arith.constant 0 : index
    %c0_19 = arith.constant 0 : index
    %43 = vector.load %arg6[%c0_18, %c0_19] : memref<64x32xf32, #tpu.memory_space<vmem>>, vector<64x32xf32>
    %cst_20 = arith.constant dense<0.000000e+00> : vector<16x32xf32>
    %44 = tpu.matmul %42, %43, %cst_20 {dimension_numbers = #tpu.dot_dimension_numbers<[1], [0], [0], [1], [0, 0, 1, 1], [], []>} : vector<16x64xf32>, vector<64x32xf32>, vector<16x32xf32> -> vector<16x32xf32>
    %c0_21 = arith.constant 0 : index
    %c0_22 = arith.constant 0 : index
    %45 = vector.load %arg7[%c0_21, %c0_22] : memref<1x32xf32, #tpu.memory_space<vmem>>, vector<1x32xf32>
    %46 = vector.broadcast %45 : vector<1x32xf32> to vector<16x32xf32>
    %47 = arith.addf %44, %46 : vector<16x32xf32>
    %48 = arith.addf %0, %47 : vector<16x32xf32>
    %c0_23 = arith.constant 0 : index
    %c0_24 = arith.constant 0 : index
    %49 = vector.load %arg8[%c0_23, %c0_24] : memref<16x32xf32, #tpu.memory_space<vmem>>, vector<16x32xf32>
    tpu.vector_store %arg8[%c0_23, %c0_24], %48 {strides = array<i32>} : memref<16x32xf32, #tpu.memory_space<vmem>>, vector<16x32xf32>,
    return
  }
  func.func @transform_0(%arg0: i32) -> (i32, i32) {
    %c0_i32 = arith.constant 0 : i32
    %c0_i32_0 = arith.constant 0 : i32
    return %arg0, %c0_i32 : i32, i32
  }
  func.func @transform_1(%arg0: i32) -> (i32, i32) {
    %c0_i32 = arith.constant 0 : i32
    %c0_i32_0 = arith.constant 0 : i32
    %c0_i32_1 = arith.constant 0 : i32
    return %c0_i32, %c0_i32_0 : i32, i32
  }
  func.func @transform_2(%arg0: i32) -> (i32, i32) {
    %c0_i32 = arith.constant 0 : i32
    %c0_i32_0 = arith.constant 0 : i32
    %c0_i32_1 = arith.constant 0 : i32
    return %c0_i32, %c0_i32_0 : i32, i32
  }
  func.func @transform_3(%arg0: i32) -> (i32, i32) {
    %c0_i32 = arith.constant 0 : i32
    %c0_i32_0 = arith.constant 0 : i32
    %c0_i32_1 = arith.constant 0 : i32
    return %c0_i32, %c0_i32_0 : i32, i32
  }
  func.func @transform_4(%arg0: i32) -> (i32, i32) {
    %c0_i32 = arith.constant 0 : i32
    %c0_i32_0 = arith.constant 0 : i32
    %c0_i32_1 = arith.constant 0 : i32
    return %c0_i32, %c0_i32_0 : i32, i32
  }
  func.func @transform_5(%arg0: i32) -> (i32, i32) {
    %c0_i32 = arith.constant 0 : i32
    %c0_i32_0 = arith.constant 0 : i32
    %c0_i32_1 = arith.constant 0 : i32
    return %c0_i32, %c0_i32_0 : i32, i32
  }
  func.func @transform_6(%arg0: i32) -> (i32, i32) {
    %c0_i32 = arith.constant 0 : i32
    %c0_i32_0 = arith.constant 0 : i32
    %c0_i32_1 = arith.constant 0 : i32
    return %c0_i32, %c0_i32_0 : i32, i32
  }
  func.func @transform_7(%arg0: i32) -> (i32, i32) {
    %c0_i32 = arith.constant 0 : i32
    %c0_i32_0 = arith.constant 0 : i32
    return %arg0, %c0_i32 : i32, i32
  }
}

module attributes {stable_mosaic.version = 11 : i64} {
  func.func @_attn_block_state_kernel(%arg0: i32, %arg1: memref<1x8x32xf32, #tpu.memory_space<vmem>>, %arg2: memref<1x32xf32, #tpu.memory_space<vmem>>, %arg3: memref<1x32xf32, #tpu.memory_space<vmem>>, %arg4: memref<32x96xf32, #tpu.memory_space<vmem>>, %arg5: memref<1x96xf32, #tpu.memory_space<vmem>>, %arg6: memref<32x32xf32, #tpu.memory_space<vmem>>, %arg7: memref<1x32xf32, #tpu.memory_space<vmem>>, %arg8: memref<8x16xf32, #tpu.memory_space<vmem>>, %arg9: memref<8x16xf32, #tpu.memory_space<vmem>>, %arg10: memref<4x32xf32, #tpu.memory_space<vmem>>, %arg11: memref<1x8x32xf32, #tpu.memory_space<vmem>>) attributes {dimension_semantics = [#tpu.dimension_semantics<parallel>], iteration_bounds = array<i64: 2>, scalar_prefetch = 0 : i64, scratch_operands = 0 : i64, tpu.core_type = #tpu.core_type<tc>, window_params = [{transform_indices = @transform_0, window_bounds = array<i64: 1, 8, 32>}, {pipeline_mode = #tpu.pipeline_mode<synchronous>, transform_indices = @transform_1, window_bounds = array<i64: 1, 32>}, {pipeline_mode = #tpu.pipeline_mode<synchronous>, transform_indices = @transform_2, window_bounds = array<i64: 1, 32>}, {pipeline_mode = #tpu.pipeline_mode<synchronous>, transform_indices = @transform_3, window_bounds = array<i64: 32, 96>}, {pipeline_mode = #tpu.pipeline_mode<synchronous>, transform_indices = @transform_4, window_bounds = array<i64: 1, 96>}, {pipeline_mode = #tpu.pipeline_mode<synchronous>, transform_indices = @transform_5, window_bounds = array<i64: 32, 32>}, {pipeline_mode = #tpu.pipeline_mode<synchronous>, transform_indices = @transform_6, window_bounds = array<i64: 1, 32>}, {pipeline_mode = #tpu.pipeline_mode<synchronous>, transform_indices = @transform_7, window_bounds = array<i64: 8, 16>}, {pipeline_mode = #tpu.pipeline_mode<synchronous>, transform_indices = @transform_8, window_bounds = array<i64: 8, 16>}, {pipeline_mode = #tpu.pipeline_mode<synchronous>, transform_indices = @transform_9, window_bounds = array<i64: 4, 32>}, {transform_indices = @transform_10, window_bounds = array<i64: 1, 8, 32>}]} {
    %c0 = arith.constant 0 : index
    %c0_0 = arith.constant 0 : index
    %c0_1 = arith.constant 0 : index
    %0 = vector.load %arg1[%c0, %c0_0, %c0_1] : memref<1x8x32xf32, #tpu.memory_space<vmem>>, vector<1x8x32xf32>
    %1 = vector.shape_cast %0 : vector<1x8x32xf32> to vector<8x32xf32>
    %c0_2 = arith.constant 0 : index
    %c0_3 = arith.constant 0 : index
    %2 = vector.load %arg2[%c0_2, %c0_3] : memref<1x32xf32, #tpu.memory_space<vmem>>, vector<1x32xf32>
    %c0_4 = arith.constant 0 : index
    %c0_5 = arith.constant 0 : index
    %3 = vector.load %arg3[%c0_4, %c0_5] : memref<1x32xf32, #tpu.memory_space<vmem>>, vector<1x32xf32>
    %cst = arith.constant dense<0.000000e+00> : vector<8xf32>
    %4 = vector.multi_reduction <add>, %1, %cst [1] : vector<8x32xf32> to vector<8xf32>
    %5 = vector.shape_cast %4 : vector<8xf32> to vector<8x1xf32>
    %cst_6 = arith.constant 3.200000e+01 : f32
    %6 = vector.broadcast %cst_6 : f32 to vector<8x1xf32>
    %7 = arith.divf %5, %6 : vector<8x1xf32>
    %8 = vector.broadcast %7 : vector<8x1xf32> to vector<8x32xf32>
    %9 = arith.subf %1, %8 : vector<8x32xf32>
    %10 = arith.mulf %9, %9 : vector<8x32xf32>
    %cst_7 = arith.constant dense<0.000000e+00> : vector<8xf32>
    %11 = vector.multi_reduction <add>, %10, %cst_7 [1] : vector<8x32xf32> to vector<8xf32>
    %12 = vector.shape_cast %11 : vector<8xf32> to vector<8x1xf32>
    %cst_8 = arith.constant 3.200000e+01 : f32
    %13 = vector.broadcast %cst_8 : f32 to vector<8x1xf32>
    %14 = arith.divf %12, %13 : vector<8x1xf32>
    %15 = vector.broadcast %7 : vector<8x1xf32> to vector<8x32xf32>
    %16 = arith.subf %1, %15 : vector<8x32xf32>
    %cst_9 = arith.constant 9.99999974E-6 : f32
    %17 = vector.broadcast %cst_9 : f32 to vector<8x1xf32>
    %18 = arith.addf %14, %17 : vector<8x1xf32>
    %19 = math.rsqrt %18 : vector<8x1xf32>
    %20 = vector.broadcast %19 : vector<8x1xf32> to vector<8x32xf32>
    %21 = arith.mulf %16, %20 : vector<8x32xf32>
    %22 = vector.broadcast %2 : vector<1x32xf32> to vector<8x32xf32>
    %23 = arith.mulf %21, %22 : vector<8x32xf32>
    %24 = vector.broadcast %3 : vector<1x32xf32> to vector<8x32xf32>
    %25 = arith.addf %23, %24 : vector<8x32xf32>
    %c0_10 = arith.constant 0 : index
    %c0_11 = arith.constant 0 : index
    %26 = vector.load %arg4[%c0_10, %c0_11] : memref<32x96xf32, #tpu.memory_space<vmem>>, vector<32x96xf32>
    %c0_12 = arith.constant 0 : index
    %c0_13 = arith.constant 0 : index
    %27 = vector.load %arg5[%c0_12, %c0_13] : memref<1x96xf32, #tpu.memory_space<vmem>>, vector<1x96xf32>
    %28 = vector.extract_strided_slice %26 {offsets = [0, 0], sizes = [32, 32], strides = [1, 1]} : vector<32x96xf32> to vector<32x32xf32>
    %cst_14 = arith.constant dense<0.000000e+00> : vector<8x32xf32>
    %29 = tpu.matmul %25, %28, %cst_14 {dimension_numbers = #tpu.dot_dimension_numbers<[1], [0], [0], [1], [0, 0, 1, 1], [], []>} : vector<8x32xf32>, vector<32x32xf32>, vector<8x32xf32> -> vector<8x32xf32>
    %30 = vector.extract_strided_slice %27 {offsets = [0, 0], sizes = [1, 32], strides = [1, 1]} : vector<1x96xf32> to vector<1x32xf32>
    %31 = vector.broadcast %30 : vector<1x32xf32> to vector<8x32xf32>
    %32 = arith.addf %29, %31 : vector<8x32xf32>
    %33 = vector.extract_strided_slice %26 {offsets = [0, 32], sizes = [32, 64], strides = [1, 1]} : vector<32x96xf32> to vector<32x64xf32>
    %cst_15 = arith.constant dense<0.000000e+00> : vector<8x64xf32>
    %34 = tpu.matmul %25, %33, %cst_15 {dimension_numbers = #tpu.dot_dimension_numbers<[1], [0], [0], [1], [0, 0, 1, 1], [], []>} : vector<8x32xf32>, vector<32x64xf32>, vector<8x64xf32> -> vector<8x64xf32>
    %35 = vector.extract_strided_slice %27 {offsets = [0, 32], sizes = [1, 64], strides = [1, 1]} : vector<1x96xf32> to vector<1x64xf32>
    %36 = vector.broadcast %35 : vector<1x64xf32> to vector<8x64xf32>
    %37 = arith.addf %34, %36 : vector<8x64xf32>
    %c0_16 = arith.constant 0 : index
    %c0_17 = arith.constant 0 : index
    %38 = vector.load %arg10[%c0_16, %c0_17] : memref<4x32xf32, #tpu.memory_space<vmem>>, vector<4x32xf32>
    %39 = vector.extract_strided_slice %26 {offsets = [0, 32], sizes = [32, 64], strides = [1, 1]} : vector<32x96xf32> to vector<32x64xf32>
    %cst_18 = arith.constant dense<0.000000e+00> : vector<4x64xf32>
    %40 = tpu.matmul %38, %39, %cst_18 {dimension_numbers = #tpu.dot_dimension_numbers<[1], [0], [0], [1], [0, 0, 1, 1], [], []>} : vector<4x32xf32>, vector<32x64xf32>, vector<4x64xf32> -> vector<4x64xf32>
    %41 = vector.extract_strided_slice %27 {offsets = [0, 32], sizes = [1, 64], strides = [1, 1]} : vector<1x96xf32> to vector<1x64xf32>
    %42 = vector.broadcast %41 : vector<1x64xf32> to vector<4x64xf32>
    %43 = arith.addf %40, %42 : vector<4x64xf32>
    %44 = vector.extract_strided_slice %37 {offsets = [0, 0], sizes = [8, 32], strides = [1, 1]} : vector<8x64xf32> to vector<8x32xf32>
    %45 = vector.extract_strided_slice %37 {offsets = [0, 32], sizes = [8, 32], strides = [1, 1]} : vector<8x64xf32> to vector<8x32xf32>
    %46 = vector.extract_strided_slice %43 {offsets = [0, 0], sizes = [4, 32], strides = [1, 1]} : vector<4x64xf32> to vector<4x32xf32>
    %47 = vector.extract_strided_slice %43 {offsets = [0, 32], sizes = [4, 32], strides = [1, 1]} : vector<4x64xf32> to vector<4x32xf32>
    %c0_19 = arith.constant 0 : index
    %c0_20 = arith.constant 0 : index
    %48 = vector.load %arg8[%c0_19, %c0_20] : memref<8x16xf32, #tpu.memory_space<vmem>>, vector<8x16xf32>
    %c0_21 = arith.constant 0 : index
    %c0_22 = arith.constant 0 : index
    %49 = vector.load %arg9[%c0_21, %c0_22] : memref<8x16xf32, #tpu.memory_space<vmem>>, vector<8x16xf32>
    %c0_23 = arith.constant 0 : index
    %c0_24 = arith.constant 0 : index
    %50 = vector.load %arg6[%c0_23, %c0_24] : memref<32x32xf32, #tpu.memory_space<vmem>>, vector<32x32xf32>
    %c0_25 = arith.constant 0 : index
    %c0_26 = arith.constant 0 : index
    %51 = vector.load %arg7[%c0_25, %c0_26] : memref<1x32xf32, #tpu.memory_space<vmem>>, vector<1x32xf32>
    %52 = tpu.iota {dimensions = array<i32: 0>} : vector<16x16xi32>
    %53 = tpu.iota {dimensions = array<i32: 1>} : vector<16x16xi32>
    %c8_i32 = arith.constant 8 : i32
    %54 = vector.broadcast %c8_i32 : i32 to vector<16x16xi32>
    %55 = arith.addi %53, %54 : vector<16x16xi32>
    %56 = arith.cmpi eq, %52, %55 : vector<16x16xi32>
    %cst_27 = arith.constant -1.000000e+00 : f32
    %cst_28 = arith.constant 0.000000e+00 : f32
    %57 = vector.broadcast %cst_27 : f32 to vector<16x16xf32>
    %58 = vector.broadcast %cst_28 : f32 to vector<16x16xf32>
    %59 = arith.select %56, %57, %58 : vector<16x16xi1>, vector<16x16xf32>
    %c8_i32_29 = arith.constant 8 : i32
    %60 = vector.broadcast %c8_i32_29 : i32 to vector<16x16xi32>
    %61 = arith.addi %52, %60 : vector<16x16xi32>
    %62 = arith.cmpi eq, %61, %53 : vector<16x16xi32>
    %cst_30 = arith.constant 1.000000e+00 : f32
    %cst_31 = arith.constant 0.000000e+00 : f32
    %63 = vector.broadcast %cst_30 : f32 to vector<16x16xf32>
    %64 = vector.broadcast %cst_31 : f32 to vector<16x16xf32>
    %65 = arith.select %62, %63, %64 : vector<16x16xi1>, vector<16x16xf32>
    %66 = arith.addf %59, %65 : vector<16x16xf32>
    %67 = tpu.iota {dimensions = array<i32: 0>} : vector<8x8xi32>
    %68 = tpu.iota {dimensions = array<i32: 1>} : vector<8x8xi32>
    %69 = arith.cmpi sle, %68, %67 : vector<8x8xi32>
    %70 = arith.subi %67, %68 : vector<8x8xi32>
    %c8_i32_32 = arith.constant 8 : i32
    %71 = vector.broadcast %c8_i32_32 : i32 to vector<8x8xi32>
    %72 = arith.cmpi slt, %70, %71 : vector<8x8xi32>
    %73 = arith.andi %69, %72 : vector<8x8xi1>
    %cst_33 = arith.constant 0.000000e+00 : f32
    %cst_34 = arith.constant -1.000000e+09 : f32
    %74 = vector.broadcast %cst_33 : f32 to vector<8x8xf32>
    %75 = vector.broadcast %cst_34 : f32 to vector<8x8xf32>
    %76 = arith.select %73, %74, %75 : vector<8x8xi1>, vector<8x8xf32>
    %cst_35 = arith.constant 0.000000e+00 : f32
    %77 = vector.broadcast %cst_35 : f32 to vector<8x32xf32>
    %78 = vector.extract_strided_slice %32 {offsets = [0, 0], sizes = [8, 16], strides = [1, 1]} : vector<8x32xf32> to vector<8x16xf32>
    %79 = arith.mulf %78, %48 : vector<8x16xf32>
    %cst_36 = arith.constant dense<0.000000e+00> : vector<8x16xf32>
    %80 = tpu.matmul %78, %66, %cst_36 {dimension_numbers = #tpu.dot_dimension_numbers<[1], [0], [0], [1], [0, 0, 1, 1], [], []>} : vector<8x16xf32>, vector<16x16xf32>, vector<8x16xf32> -> vector<8x16xf32>
    %81 = arith.mulf %80, %49 : vector<8x16xf32>
    %82 = arith.addf %79, %81 : vector<8x16xf32>
    %cst_37 = arith.constant 2.500000e-01 : f32
    %83 = vector.broadcast %cst_37 : f32 to vector<8x16xf32>
    %84 = arith.mulf %82, %83 : vector<8x16xf32>
    %85 = vector.extract_strided_slice %44 {offsets = [0, 0], sizes = [8, 16], strides = [1, 1]} : vector<8x32xf32> to vector<8x16xf32>
    %86 = arith.mulf %85, %48 : vector<8x16xf32>
    %cst_38 = arith.constant dense<0.000000e+00> : vector<8x16xf32>
    %87 = tpu.matmul %85, %66, %cst_38 {dimension_numbers = #tpu.dot_dimension_numbers<[1], [0], [0], [1], [0, 0, 1, 1], [], []>} : vector<8x16xf32>, vector<16x16xf32>, vector<8x16xf32> -> vector<8x16xf32>
    %88 = arith.mulf %87, %49 : vector<8x16xf32>
    %89 = arith.addf %86, %88 : vector<8x16xf32>
    %90 = vector.extract_strided_slice %45 {offsets = [0, 0], sizes = [8, 16], strides = [1, 1]} : vector<8x32xf32> to vector<8x16xf32>
    %cst_39 = arith.constant dense<0.000000e+00> : vector<8x8xf32>
    %91 = tpu.matmul %84, %89, %cst_39 {dimension_numbers = #tpu.dot_dimension_numbers<[1], [1], [0], [0], [0, 0, 1, 0], [], []>} : vector<8x16xf32>, vector<8x16xf32>, vector<8x8xf32> -> vector<8x8xf32>
    %92 = arith.addf %91, %76 : vector<8x8xf32>
    %93 = vector.extract_strided_slice %46 {offsets = [0, 0], sizes = [4, 16], strides = [1, 1]} : vector<4x32xf32> to vector<4x16xf32>
    %94 = vector.extract_strided_slice %47 {offsets = [0, 0], sizes = [4, 16], strides = [1, 1]} : vector<4x32xf32> to vector<4x16xf32>
    %cst_40 = arith.constant dense<0.000000e+00> : vector<8x4xf32>
    %95 = tpu.matmul %84, %93, %cst_40 {dimension_numbers = #tpu.dot_dimension_numbers<[1], [1], [0], [0], [0, 0, 1, 0], [], []>} : vector<8x16xf32>, vector<4x16xf32>, vector<8x4xf32> -> vector<8x4xf32>
    %cst_41 = arith.constant dense<0xFF800000> : vector<8xf32>
    %96 = vector.multi_reduction <maximumf>, %92, %cst_41 [1] : vector<8x8xf32> to vector<8xf32>
    %97 = vector.shape_cast %96 : vector<8xf32> to vector<8x1xf32>
    %cst_42 = arith.constant dense<0xFF800000> : vector<8xf32>
    %98 = vector.multi_reduction <maximumf>, %95, %cst_42 [1] : vector<8x4xf32> to vector<8xf32>
    %99 = vector.shape_cast %98 : vector<8xf32> to vector<8x1xf32>
    %100 = arith.maximumf %97, %99 : vector<8x1xf32>
    %101 = vector.broadcast %100 : vector<8x1xf32> to vector<8x8xf32>
    %102 = arith.subf %92, %101 : vector<8x8xf32>
    %103 = math.exp %102 : vector<8x8xf32>
    %104 = vector.broadcast %100 : vector<8x1xf32> to vector<8x4xf32>
    %105 = arith.subf %95, %104 : vector<8x4xf32>
    %106 = math.exp %105 : vector<8x4xf32>
    %cst_43 = arith.constant dense<0.000000e+00> : vector<8xf32>
    %107 = vector.multi_reduction <add>, %103, %cst_43 [1] : vector<8x8xf32> to vector<8xf32>
    %108 = vector.shape_cast %107 : vector<8xf32> to vector<8x1xf32>
    %cst_44 = arith.constant dense<0.000000e+00> : vector<8xf32>
    %109 = vector.multi_reduction <add>, %106, %cst_44 [1] : vector<8x4xf32> to vector<8xf32>
    %110 = vector.shape_cast %109 : vector<8xf32> to vector<8x1xf32>
    %111 = arith.addf %108, %110 : vector<8x1xf32>
    %cst_45 = arith.constant dense<0.000000e+00> : vector<8x16xf32>
    %112 = tpu.matmul %103, %90, %cst_45 {dimension_numbers = #tpu.dot_dimension_numbers<[1], [0], [0], [1], [0, 0, 1, 1], [], []>} : vector<8x8xf32>, vector<8x16xf32>, vector<8x16xf32> -> vector<8x16xf32>
    %cst_46 = arith.constant dense<0.000000e+00> : vector<8x16xf32>
    %113 = tpu.matmul %106, %94, %cst_46 {dimension_numbers = #tpu.dot_dimension_numbers<[1], [0], [0], [1], [0, 0, 1, 1], [], []>} : vector<8x4xf32>, vector<4x16xf32>, vector<8x16xf32> -> vector<8x16xf32>
    %114 = arith.addf %112, %113 : vector<8x16xf32>
    %115 = tpu.reciprocal %111 {approx = true} : vector<8x1xf32> -> vector<8x1xf32>
    %116 = vector.broadcast %115 : vector<8x1xf32> to vector<8x16xf32>
    %117 = arith.mulf %114, %116 : vector<8x16xf32>
    %118 = vector.extract_strided_slice %50 {offsets = [0, 0], sizes = [16, 32], strides = [1, 1]} : vector<32x32xf32> to vector<16x32xf32>
    %cst_47 = arith.constant dense<0.000000e+00> : vector<8x32xf32>
    %119 = tpu.matmul %117, %118, %cst_47 {dimension_numbers = #tpu.dot_dimension_numbers<[1], [0], [0], [1], [0, 0, 1, 1], [], []>} : vector<8x16xf32>, vector<16x32xf32>, vector<8x32xf32> -> vector<8x32xf32>
    %120 = arith.addf %77, %119 : vector<8x32xf32>
    %121 = vector.extract_strided_slice %32 {offsets = [0, 16], sizes = [8, 16], strides = [1, 1]} : vector<8x32xf32> to vector<8x16xf32>
    %122 = arith.mulf %121, %48 : vector<8x16xf32>
    %cst_48 = arith.constant dense<0.000000e+00> : vector<8x16xf32>
    %123 = tpu.matmul %121, %66, %cst_48 {dimension_numbers = #tpu.dot_dimension_numbers<[1], [0], [0], [1], [0, 0, 1, 1], [], []>} : vector<8x16xf32>, vector<16x16xf32>, vector<8x16xf32> -> vector<8x16xf32>
    %124 = arith.mulf %123, %49 : vector<8x16xf32>
    %125 = arith.addf %122, %124 : vector<8x16xf32>
    %cst_49 = arith.constant 2.500000e-01 : f32
    %126 = vector.broadcast %cst_49 : f32 to vector<8x16xf32>
    %127 = arith.mulf %125, %126 : vector<8x16xf32>
    %128 = vector.extract_strided_slice %44 {offsets = [0, 16], sizes = [8, 16], strides = [1, 1]} : vector<8x32xf32> to vector<8x16xf32>
    %129 = arith.mulf %128, %48 : vector<8x16xf32>
    %cst_50 = arith.constant dense<0.000000e+00> : vector<8x16xf32>
    %130 = tpu.matmul %128, %66, %cst_50 {dimension_numbers = #tpu.dot_dimension_numbers<[1], [0], [0], [1], [0, 0, 1, 1], [], []>} : vector<8x16xf32>, vector<16x16xf32>, vector<8x16xf32> -> vector<8x16xf32>
    %131 = arith.mulf %130, %49 : vector<8x16xf32>
    %132 = arith.addf %129, %131 : vector<8x16xf32>
    %133 = vector.extract_strided_slice %45 {offsets = [0, 16], sizes = [8, 16], strides = [1, 1]} : vector<8x32xf32> to vector<8x16xf32>
    %cst_51 = arith.constant dense<0.000000e+00> : vector<8x8xf32>
    %134 = tpu.matmul %127, %132, %cst_51 {dimension_numbers = #tpu.dot_dimension_numbers<[1], [1], [0], [0], [0, 0, 1, 0], [], []>} : vector<8x16xf32>, vector<8x16xf32>, vector<8x8xf32> -> vector<8x8xf32>
    %135 = arith.addf %134, %76 : vector<8x8xf32>
    %136 = vector.extract_strided_slice %46 {offsets = [0, 16], sizes = [4, 16], strides = [1, 1]} : vector<4x32xf32> to vector<4x16xf32>
    %137 = vector.extract_strided_slice %47 {offsets = [0, 16], sizes = [4, 16], strides = [1, 1]} : vector<4x32xf32> to vector<4x16xf32>
    %cst_52 = arith.constant dense<0.000000e+00> : vector<8x4xf32>
    %138 = tpu.matmul %127, %136, %cst_52 {dimension_numbers = #tpu.dot_dimension_numbers<[1], [1], [0], [0], [0, 0, 1, 0], [], []>} : vector<8x16xf32>, vector<4x16xf32>, vector<8x4xf32> -> vector<8x4xf32>
    %cst_53 = arith.constant dense<0xFF800000> : vector<8xf32>
    %139 = vector.multi_reduction <maximumf>, %135, %cst_53 [1] : vector<8x8xf32> to vector<8xf32>
    %140 = vector.shape_cast %139 : vector<8xf32> to vector<8x1xf32>
    %cst_54 = arith.constant dense<0xFF800000> : vector<8xf32>
    %141 = vector.multi_reduction <maximumf>, %138, %cst_54 [1] : vector<8x4xf32> to vector<8xf32>
    %142 = vector.shape_cast %141 : vector<8xf32> to vector<8x1xf32>
    %143 = arith.maximumf %140, %142 : vector<8x1xf32>
    %144 = vector.broadcast %143 : vector<8x1xf32> to vector<8x8xf32>
    %145 = arith.subf %135, %144 : vector<8x8xf32>
    %146 = math.exp %145 : vector<8x8xf32>
    %147 = vector.broadcast %143 : vector<8x1xf32> to vector<8x4xf32>
    %148 = arith.subf %138, %147 : vector<8x4xf32>
    %149 = math.exp %148 : vector<8x4xf32>
    %cst_55 = arith.constant dense<0.000000e+00> : vector<8xf32>
    %150 = vector.multi_reduction <add>, %146, %cst_55 [1] : vector<8x8xf32> to vector<8xf32>
    %151 = vector.shape_cast %150 : vector<8xf32> to vector<8x1xf32>
    %cst_56 = arith.constant dense<0.000000e+00> : vector<8xf32>
    %152 = vector.multi_reduction <add>, %149, %cst_56 [1] : vector<8x4xf32> to vector<8xf32>
    %153 = vector.shape_cast %152 : vector<8xf32> to vector<8x1xf32>
    %154 = arith.addf %151, %153 : vector<8x1xf32>
    %cst_57 = arith.constant dense<0.000000e+00> : vector<8x16xf32>
    %155 = tpu.matmul %146, %133, %cst_57 {dimension_numbers = #tpu.dot_dimension_numbers<[1], [0], [0], [1], [0, 0, 1, 1], [], []>} : vector<8x8xf32>, vector<8x16xf32>, vector<8x16xf32> -> vector<8x16xf32>
    %cst_58 = arith.constant dense<0.000000e+00> : vector<8x16xf32>
    %156 = tpu.matmul %149, %137, %cst_58 {dimension_numbers = #tpu.dot_dimension_numbers<[1], [0], [0], [1], [0, 0, 1, 1], [], []>} : vector<8x4xf32>, vector<4x16xf32>, vector<8x16xf32> -> vector<8x16xf32>
    %157 = arith.addf %155, %156 : vector<8x16xf32>
    %158 = tpu.reciprocal %154 {approx = true} : vector<8x1xf32> -> vector<8x1xf32>
    %159 = vector.broadcast %158 : vector<8x1xf32> to vector<8x16xf32>
    %160 = arith.mulf %157, %159 : vector<8x16xf32>
    %161 = vector.extract_strided_slice %50 {offsets = [16, 0], sizes = [16, 32], strides = [1, 1]} : vector<32x32xf32> to vector<16x32xf32>
    %cst_59 = arith.constant dense<0.000000e+00> : vector<8x32xf32>
    %162 = tpu.matmul %160, %161, %cst_59 {dimension_numbers = #tpu.dot_dimension_numbers<[1], [0], [0], [1], [0, 0, 1, 1], [], []>} : vector<8x16xf32>, vector<16x32xf32>, vector<8x32xf32> -> vector<8x32xf32>
    %163 = arith.addf %120, %162 : vector<8x32xf32>
    %164 = vector.broadcast %51 : vector<1x32xf32> to vector<8x32xf32>
    %165 = arith.addf %163, %164 : vector<8x32xf32>
    %166 = arith.addf %1, %165 : vector<8x32xf32>
    %c0_60 = arith.constant 0 : index
    %c0_61 = arith.constant 0 : index
    %c0_62 = arith.constant 0 : index
    %167 = vector.load %arg11[%c0_60, %c0_61, %c0_62] : memref<1x8x32xf32, #tpu.memory_space<vmem>>, vector<1x8x32xf32>
    %168 = vector.shape_cast %167 : vector<1x8x32xf32> to vector<8x32xf32>
    %169 = vector.shape_cast %166 : vector<8x32xf32> to vector<1x8x32xf32>
    tpu.vector_store %arg11[%c0_60, %c0_61, %c0_62], %169 {strides = array<i32>} : memref<1x8x32xf32, #tpu.memory_space<vmem>>, vector<1x8x32xf32>,
    return
  }
  func.func @transform_0(%arg0: i32) -> (i32, i32, i32) {
    %c0_i32 = arith.constant 0 : i32
    %c0_i32_0 = arith.constant 0 : i32
    %c0_i32_1 = arith.constant 0 : i32
    return %arg0, %c0_i32, %c0_i32_0 : i32, i32, i32
  }
  func.func @transform_1(%arg0: i32) -> (i32, i32) {
    %c0_i32 = arith.constant 0 : i32
    %c0_i32_0 = arith.constant 0 : i32
    %c0_i32_1 = arith.constant 0 : i32
    return %c0_i32, %c0_i32_0 : i32, i32
  }
  func.func @transform_2(%arg0: i32) -> (i32, i32) {
    %c0_i32 = arith.constant 0 : i32
    %c0_i32_0 = arith.constant 0 : i32
    %c0_i32_1 = arith.constant 0 : i32
    return %c0_i32, %c0_i32_0 : i32, i32
  }
  func.func @transform_3(%arg0: i32) -> (i32, i32) {
    %c0_i32 = arith.constant 0 : i32
    %c0_i32_0 = arith.constant 0 : i32
    %c0_i32_1 = arith.constant 0 : i32
    return %c0_i32, %c0_i32_0 : i32, i32
  }
  func.func @transform_4(%arg0: i32) -> (i32, i32) {
    %c0_i32 = arith.constant 0 : i32
    %c0_i32_0 = arith.constant 0 : i32
    %c0_i32_1 = arith.constant 0 : i32
    return %c0_i32, %c0_i32_0 : i32, i32
  }
  func.func @transform_5(%arg0: i32) -> (i32, i32) {
    %c0_i32 = arith.constant 0 : i32
    %c0_i32_0 = arith.constant 0 : i32
    %c0_i32_1 = arith.constant 0 : i32
    return %c0_i32, %c0_i32_0 : i32, i32
  }
  func.func @transform_6(%arg0: i32) -> (i32, i32) {
    %c0_i32 = arith.constant 0 : i32
    %c0_i32_0 = arith.constant 0 : i32
    %c0_i32_1 = arith.constant 0 : i32
    return %c0_i32, %c0_i32_0 : i32, i32
  }
  func.func @transform_7(%arg0: i32) -> (i32, i32) {
    %c0_i32 = arith.constant 0 : i32
    %c0_i32_0 = arith.constant 0 : i32
    %c0_i32_1 = arith.constant 0 : i32
    return %c0_i32, %c0_i32_0 : i32, i32
  }
  func.func @transform_8(%arg0: i32) -> (i32, i32) {
    %c0_i32 = arith.constant 0 : i32
    %c0_i32_0 = arith.constant 0 : i32
    %c0_i32_1 = arith.constant 0 : i32
    return %c0_i32, %c0_i32_0 : i32, i32
  }
  func.func @transform_9(%arg0: i32) -> (i32, i32) {
    %c0_i32 = arith.constant 0 : i32
    %c0_i32_0 = arith.constant 0 : i32
    %c0_i32_1 = arith.constant 0 : i32
    return %c0_i32, %c0_i32_0 : i32, i32
  }
  func.func @transform_10(%arg0: i32) -> (i32, i32, i32) {
    %c0_i32 = arith.constant 0 : i32
    %c0_i32_0 = arith.constant 0 : i32
    %c0_i32_1 = arith.constant 0 : i32
    return %arg0, %c0_i32, %c0_i32_0 : i32, i32, i32
  }
}

module attributes {stable_mosaic.version = 11 : i64} {
  func.func @_attn_block_kernel(%arg0: i32, %arg1: memref<1x8x32xf32, #tpu.memory_space<vmem>>, %arg2: memref<1x32xf32, #tpu.memory_space<vmem>>, %arg3: memref<1x32xf32, #tpu.memory_space<vmem>>, %arg4: memref<32x96xf32, #tpu.memory_space<vmem>>, %arg5: memref<1x96xf32, #tpu.memory_space<vmem>>, %arg6: memref<32x32xf32, #tpu.memory_space<vmem>>, %arg7: memref<1x32xf32, #tpu.memory_space<vmem>>, %arg8: memref<8x16xf32, #tpu.memory_space<vmem>>, %arg9: memref<8x16xf32, #tpu.memory_space<vmem>>, %arg10: memref<1x8x32xf32, #tpu.memory_space<vmem>>) attributes {dimension_semantics = [#tpu.dimension_semantics<parallel>], iteration_bounds = array<i64: 2>, scalar_prefetch = 0 : i64, scratch_operands = 0 : i64, tpu.core_type = #tpu.core_type<tc>, window_params = [{transform_indices = @transform_0, window_bounds = array<i64: 1, 8, 32>}, {pipeline_mode = #tpu.pipeline_mode<synchronous>, transform_indices = @transform_1, window_bounds = array<i64: 1, 32>}, {pipeline_mode = #tpu.pipeline_mode<synchronous>, transform_indices = @transform_2, window_bounds = array<i64: 1, 32>}, {pipeline_mode = #tpu.pipeline_mode<synchronous>, transform_indices = @transform_3, window_bounds = array<i64: 32, 96>}, {pipeline_mode = #tpu.pipeline_mode<synchronous>, transform_indices = @transform_4, window_bounds = array<i64: 1, 96>}, {pipeline_mode = #tpu.pipeline_mode<synchronous>, transform_indices = @transform_5, window_bounds = array<i64: 32, 32>}, {pipeline_mode = #tpu.pipeline_mode<synchronous>, transform_indices = @transform_6, window_bounds = array<i64: 1, 32>}, {pipeline_mode = #tpu.pipeline_mode<synchronous>, transform_indices = @transform_7, window_bounds = array<i64: 8, 16>}, {pipeline_mode = #tpu.pipeline_mode<synchronous>, transform_indices = @transform_8, window_bounds = array<i64: 8, 16>}, {transform_indices = @transform_9, window_bounds = array<i64: 1, 8, 32>}]} {
    %c0 = arith.constant 0 : index
    %c0_0 = arith.constant 0 : index
    %c0_1 = arith.constant 0 : index
    %0 = vector.load %arg1[%c0, %c0_0, %c0_1] : memref<1x8x32xf32, #tpu.memory_space<vmem>>, vector<1x8x32xf32>
    %1 = vector.shape_cast %0 : vector<1x8x32xf32> to vector<8x32xf32>
    %c0_2 = arith.constant 0 : index
    %c0_3 = arith.constant 0 : index
    %2 = vector.load %arg2[%c0_2, %c0_3] : memref<1x32xf32, #tpu.memory_space<vmem>>, vector<1x32xf32>
    %c0_4 = arith.constant 0 : index
    %c0_5 = arith.constant 0 : index
    %3 = vector.load %arg3[%c0_4, %c0_5] : memref<1x32xf32, #tpu.memory_space<vmem>>, vector<1x32xf32>
    %cst = arith.constant dense<0.000000e+00> : vector<8xf32>
    %4 = vector.multi_reduction <add>, %1, %cst [1] : vector<8x32xf32> to vector<8xf32>
    %5 = vector.shape_cast %4 : vector<8xf32> to vector<8x1xf32>
    %cst_6 = arith.constant 3.200000e+01 : f32
    %6 = vector.broadcast %cst_6 : f32 to vector<8x1xf32>
    %7 = arith.divf %5, %6 : vector<8x1xf32>
    %8 = vector.broadcast %7 : vector<8x1xf32> to vector<8x32xf32>
    %9 = arith.subf %1, %8 : vector<8x32xf32>
    %10 = arith.mulf %9, %9 : vector<8x32xf32>
    %cst_7 = arith.constant dense<0.000000e+00> : vector<8xf32>
    %11 = vector.multi_reduction <add>, %10, %cst_7 [1] : vector<8x32xf32> to vector<8xf32>
    %12 = vector.shape_cast %11 : vector<8xf32> to vector<8x1xf32>
    %cst_8 = arith.constant 3.200000e+01 : f32
    %13 = vector.broadcast %cst_8 : f32 to vector<8x1xf32>
    %14 = arith.divf %12, %13 : vector<8x1xf32>
    %15 = vector.broadcast %7 : vector<8x1xf32> to vector<8x32xf32>
    %16 = arith.subf %1, %15 : vector<8x32xf32>
    %cst_9 = arith.constant 9.99999974E-6 : f32
    %17 = vector.broadcast %cst_9 : f32 to vector<8x1xf32>
    %18 = arith.addf %14, %17 : vector<8x1xf32>
    %19 = math.rsqrt %18 : vector<8x1xf32>
    %20 = vector.broadcast %19 : vector<8x1xf32> to vector<8x32xf32>
    %21 = arith.mulf %16, %20 : vector<8x32xf32>
    %22 = vector.broadcast %2 : vector<1x32xf32> to vector<8x32xf32>
    %23 = arith.mulf %21, %22 : vector<8x32xf32>
    %24 = vector.broadcast %3 : vector<1x32xf32> to vector<8x32xf32>
    %25 = arith.addf %23, %24 : vector<8x32xf32>
    %c0_10 = arith.constant 0 : index
    %c0_11 = arith.constant 0 : index
    %26 = vector.load %arg4[%c0_10, %c0_11] : memref<32x96xf32, #tpu.memory_space<vmem>>, vector<32x96xf32>
    %c0_12 = arith.constant 0 : index
    %c0_13 = arith.constant 0 : index
    %27 = vector.load %arg5[%c0_12, %c0_13] : memref<1x96xf32, #tpu.memory_space<vmem>>, vector<1x96xf32>
    %cst_14 = arith.constant dense<0.000000e+00> : vector<8x96xf32>
    %28 = tpu.matmul %25, %26, %cst_14 {dimension_numbers = #tpu.dot_dimension_numbers<[1], [0], [0], [1], [0, 0, 1, 1], [], []>} : vector<8x32xf32>, vector<32x96xf32>, vector<8x96xf32> -> vector<8x96xf32>
    %29 = vector.broadcast %27 : vector<1x96xf32> to vector<8x96xf32>
    %30 = arith.addf %28, %29 : vector<8x96xf32>
    %31 = vector.extract_strided_slice %30 {offsets = [0, 0], sizes = [8, 32], strides = [1, 1]} : vector<8x96xf32> to vector<8x32xf32>
    %32 = vector.extract_strided_slice %30 {offsets = [0, 32], sizes = [8, 32], strides = [1, 1]} : vector<8x96xf32> to vector<8x32xf32>
    %33 = vector.extract_strided_slice %30 {offsets = [0, 64], sizes = [8, 32], strides = [1, 1]} : vector<8x96xf32> to vector<8x32xf32>
    %c0_15 = arith.constant 0 : index
    %c0_16 = arith.constant 0 : index
    %34 = vector.load %arg8[%c0_15, %c0_16] : memref<8x16xf32, #tpu.memory_space<vmem>>, vector<8x16xf32>
    %c0_17 = arith.constant 0 : index
    %c0_18 = arith.constant 0 : index
    %35 = vector.load %arg9[%c0_17, %c0_18] : memref<8x16xf32, #tpu.memory_space<vmem>>, vector<8x16xf32>
    %c0_19 = arith.constant 0 : index
    %c0_20 = arith.constant 0 : index
    %36 = vector.load %arg6[%c0_19, %c0_20] : memref<32x32xf32, #tpu.memory_space<vmem>>, vector<32x32xf32>
    %c0_21 = arith.constant 0 : index
    %c0_22 = arith.constant 0 : index
    %37 = vector.load %arg7[%c0_21, %c0_22] : memref<1x32xf32, #tpu.memory_space<vmem>>, vector<1x32xf32>
    %38 = tpu.iota {dimensions = array<i32: 0>} : vector<16x16xi32>
    %39 = tpu.iota {dimensions = array<i32: 1>} : vector<16x16xi32>
    %c8_i32 = arith.constant 8 : i32
    %40 = vector.broadcast %c8_i32 : i32 to vector<16x16xi32>
    %41 = arith.addi %39, %40 : vector<16x16xi32>
    %42 = arith.cmpi eq, %38, %41 : vector<16x16xi32>
    %cst_23 = arith.constant -1.000000e+00 : f32
    %cst_24 = arith.constant 0.000000e+00 : f32
    %43 = vector.broadcast %cst_23 : f32 to vector<16x16xf32>
    %44 = vector.broadcast %cst_24 : f32 to vector<16x16xf32>
    %45 = arith.select %42, %43, %44 : vector<16x16xi1>, vector<16x16xf32>
    %c8_i32_25 = arith.constant 8 : i32
    %46 = vector.broadcast %c8_i32_25 : i32 to vector<16x16xi32>
    %47 = arith.addi %38, %46 : vector<16x16xi32>
    %48 = arith.cmpi eq, %47, %39 : vector<16x16xi32>
    %cst_26 = arith.constant 1.000000e+00 : f32
    %cst_27 = arith.constant 0.000000e+00 : f32
    %49 = vector.broadcast %cst_26 : f32 to vector<16x16xf32>
    %50 = vector.broadcast %cst_27 : f32 to vector<16x16xf32>
    %51 = arith.select %48, %49, %50 : vector<16x16xi1>, vector<16x16xf32>
    %52 = arith.addf %45, %51 : vector<16x16xf32>
    %53 = tpu.iota {dimensions = array<i32: 0>} : vector<8x8xi32>
    %54 = tpu.iota {dimensions = array<i32: 1>} : vector<8x8xi32>
    %55 = arith.cmpi sle, %54, %53 : vector<8x8xi32>
    %56 = arith.subi %53, %54 : vector<8x8xi32>
    %c8_i32_28 = arith.constant 8 : i32
    %57 = vector.broadcast %c8_i32_28 : i32 to vector<8x8xi32>
    %58 = arith.cmpi slt, %56, %57 : vector<8x8xi32>
    %59 = arith.andi %55, %58 : vector<8x8xi1>
    %cst_29 = arith.constant 0.000000e+00 : f32
    %cst_30 = arith.constant -1.000000e+09 : f32
    %60 = vector.broadcast %cst_29 : f32 to vector<8x8xf32>
    %61 = vector.broadcast %cst_30 : f32 to vector<8x8xf32>
    %62 = arith.select %59, %60, %61 : vector<8x8xi1>, vector<8x8xf32>
    %cst_31 = arith.constant 0.000000e+00 : f32
    %63 = vector.broadcast %cst_31 : f32 to vector<8x32xf32>
    %64 = vector.extract_strided_slice %31 {offsets = [0, 0], sizes = [8, 16], strides = [1, 1]} : vector<8x32xf32> to vector<8x16xf32>
    %65 = arith.mulf %64, %34 : vector<8x16xf32>
    %cst_32 = arith.constant dense<0.000000e+00> : vector<8x16xf32>
    %66 = tpu.matmul %64, %52, %cst_32 {dimension_numbers = #tpu.dot_dimension_numbers<[1], [0], [0], [1], [0, 0, 1, 1], [], []>} : vector<8x16xf32>, vector<16x16xf32>, vector<8x16xf32> -> vector<8x16xf32>
    %67 = arith.mulf %66, %35 : vector<8x16xf32>
    %68 = arith.addf %65, %67 : vector<8x16xf32>
    %cst_33 = arith.constant 2.500000e-01 : f32
    %69 = vector.broadcast %cst_33 : f32 to vector<8x16xf32>
    %70 = arith.mulf %68, %69 : vector<8x16xf32>
    %71 = vector.extract_strided_slice %32 {offsets = [0, 0], sizes = [8, 16], strides = [1, 1]} : vector<8x32xf32> to vector<8x16xf32>
    %72 = arith.mulf %71, %34 : vector<8x16xf32>
    %cst_34 = arith.constant dense<0.000000e+00> : vector<8x16xf32>
    %73 = tpu.matmul %71, %52, %cst_34 {dimension_numbers = #tpu.dot_dimension_numbers<[1], [0], [0], [1], [0, 0, 1, 1], [], []>} : vector<8x16xf32>, vector<16x16xf32>, vector<8x16xf32> -> vector<8x16xf32>
    %74 = arith.mulf %73, %35 : vector<8x16xf32>
    %75 = arith.addf %72, %74 : vector<8x16xf32>
    %76 = vector.extract_strided_slice %33 {offsets = [0, 0], sizes = [8, 16], strides = [1, 1]} : vector<8x32xf32> to vector<8x16xf32>
    %cst_35 = arith.constant dense<0.000000e+00> : vector<8x8xf32>
    %77 = tpu.matmul %70, %75, %cst_35 {dimension_numbers = #tpu.dot_dimension_numbers<[1], [1], [0], [0], [0, 0, 1, 0], [], []>} : vector<8x16xf32>, vector<8x16xf32>, vector<8x8xf32> -> vector<8x8xf32>
    %78 = arith.addf %77, %62 : vector<8x8xf32>
    %cst_36 = arith.constant dense<0xFF800000> : vector<8xf32>
    %79 = vector.multi_reduction <maximumf>, %78, %cst_36 [1] : vector<8x8xf32> to vector<8xf32>
    %80 = vector.shape_cast %79 : vector<8xf32> to vector<8x1xf32>
    %81 = vector.broadcast %80 : vector<8x1xf32> to vector<8x8xf32>
    %82 = arith.subf %78, %81 : vector<8x8xf32>
    %83 = math.exp %82 : vector<8x8xf32>
    %cst_37 = arith.constant dense<0.000000e+00> : vector<8xf32>
    %84 = vector.multi_reduction <add>, %83, %cst_37 [1] : vector<8x8xf32> to vector<8xf32>
    %85 = vector.shape_cast %84 : vector<8xf32> to vector<8x1xf32>
    %cst_38 = arith.constant dense<0.000000e+00> : vector<8x16xf32>
    %86 = tpu.matmul %83, %76, %cst_38 {dimension_numbers = #tpu.dot_dimension_numbers<[1], [0], [0], [1], [0, 0, 1, 1], [], []>} : vector<8x8xf32>, vector<8x16xf32>, vector<8x16xf32> -> vector<8x16xf32>
    %87 = tpu.reciprocal %85 {approx = true} : vector<8x1xf32> -> vector<8x1xf32>
    %88 = vector.broadcast %87 : vector<8x1xf32> to vector<8x16xf32>
    %89 = arith.mulf %86, %88 : vector<8x16xf32>
    %90 = vector.extract_strided_slice %36 {offsets = [0, 0], sizes = [16, 32], strides = [1, 1]} : vector<32x32xf32> to vector<16x32xf32>
    %cst_39 = arith.constant dense<0.000000e+00> : vector<8x32xf32>
    %91 = tpu.matmul %89, %90, %cst_39 {dimension_numbers = #tpu.dot_dimension_numbers<[1], [0], [0], [1], [0, 0, 1, 1], [], []>} : vector<8x16xf32>, vector<16x32xf32>, vector<8x32xf32> -> vector<8x32xf32>
    %92 = arith.addf %63, %91 : vector<8x32xf32>
    %93 = vector.extract_strided_slice %31 {offsets = [0, 16], sizes = [8, 16], strides = [1, 1]} : vector<8x32xf32> to vector<8x16xf32>
    %94 = arith.mulf %93, %34 : vector<8x16xf32>
    %cst_40 = arith.constant dense<0.000000e+00> : vector<8x16xf32>
    %95 = tpu.matmul %93, %52, %cst_40 {dimension_numbers = #tpu.dot_dimension_numbers<[1], [0], [0], [1], [0, 0, 1, 1], [], []>} : vector<8x16xf32>, vector<16x16xf32>, vector<8x16xf32> -> vector<8x16xf32>
    %96 = arith.mulf %95, %35 : vector<8x16xf32>
    %97 = arith.addf %94, %96 : vector<8x16xf32>
    %cst_41 = arith.constant 2.500000e-01 : f32
    %98 = vector.broadcast %cst_41 : f32 to vector<8x16xf32>
    %99 = arith.mulf %97, %98 : vector<8x16xf32>
    %100 = vector.extract_strided_slice %32 {offsets = [0, 16], sizes = [8, 16], strides = [1, 1]} : vector<8x32xf32> to vector<8x16xf32>
    %101 = arith.mulf %100, %34 : vector<8x16xf32>
    %cst_42 = arith.constant dense<0.000000e+00> : vector<8x16xf32>
    %102 = tpu.matmul %100, %52, %cst_42 {dimension_numbers = #tpu.dot_dimension_numbers<[1], [0], [0], [1], [0, 0, 1, 1], [], []>} : vector<8x16xf32>, vector<16x16xf32>, vector<8x16xf32> -> vector<8x16xf32>
    %103 = arith.mulf %102, %35 : vector<8x16xf32>
    %104 = arith.addf %101, %103 : vector<8x16xf32>
    %105 = vector.extract_strided_slice %33 {offsets = [0, 16], sizes = [8, 16], strides = [1, 1]} : vector<8x32xf32> to vector<8x16xf32>
    %cst_43 = arith.constant dense<0.000000e+00> : vector<8x8xf32>
    %106 = tpu.matmul %99, %104, %cst_43 {dimension_numbers = #tpu.dot_dimension_numbers<[1], [1], [0], [0], [0, 0, 1, 0], [], []>} : vector<8x16xf32>, vector<8x16xf32>, vector<8x8xf32> -> vector<8x8xf32>
    %107 = arith.addf %106, %62 : vector<8x8xf32>
    %cst_44 = arith.constant dense<0xFF800000> : vector<8xf32>
    %108 = vector.multi_reduction <maximumf>, %107, %cst_44 [1] : vector<8x8xf32> to vector<8xf32>
    %109 = vector.shape_cast %108 : vector<8xf32> to vector<8x1xf32>
    %110 = vector.broadcast %109 : vector<8x1xf32> to vector<8x8xf32>
    %111 = arith.subf %107, %110 : vector<8x8xf32>
    %112 = math.exp %111 : vector<8x8xf32>
    %cst_45 = arith.constant dense<0.000000e+00> : vector<8xf32>
    %113 = vector.multi_reduction <add>, %112, %cst_45 [1] : vector<8x8xf32> to vector<8xf32>
    %114 = vector.shape_cast %113 : vector<8xf32> to vector<8x1xf32>
    %cst_46 = arith.constant dense<0.000000e+00> : vector<8x16xf32>
    %115 = tpu.matmul %112, %105, %cst_46 {dimension_numbers = #tpu.dot_dimension_numbers<[1], [0], [0], [1], [0, 0, 1, 1], [], []>} : vector<8x8xf32>, vector<8x16xf32>, vector<8x16xf32> -> vector<8x16xf32>
    %116 = tpu.reciprocal %114 {approx = true} : vector<8x1xf32> -> vector<8x1xf32>
    %117 = vector.broadcast %116 : vector<8x1xf32> to vector<8x16xf32>
    %118 = arith.mulf %115, %117 : vector<8x16xf32>
    %119 = vector.extract_strided_slice %36 {offsets = [16, 0], sizes = [16, 32], strides = [1, 1]} : vector<32x32xf32> to vector<16x32xf32>
    %cst_47 = arith.constant dense<0.000000e+00> : vector<8x32xf32>
    %120 = tpu.matmul %118, %119, %cst_47 {dimension_numbers = #tpu.dot_dimension_numbers<[1], [0], [0], [1], [0, 0, 1, 1], [], []>} : vector<8x16xf32>, vector<16x32xf32>, vector<8x32xf32> -> vector<8x32xf32>
    %121 = arith.addf %92, %120 : vector<8x32xf32>
    %122 = vector.broadcast %37 : vector<1x32xf32> to vector<8x32xf32>
    %123 = arith.addf %121, %122 : vector<8x32xf32>
    %124 = arith.addf %1, %123 : vector<8x32xf32>
    %c0_48 = arith.constant 0 : index
    %c0_49 = arith.constant 0 : index
    %c0_50 = arith.constant 0 : index
    %125 = vector.load %arg10[%c0_48, %c0_49, %c0_50] : memref<1x8x32xf32, #tpu.memory_space<vmem>>, vector<1x8x32xf32>
    %126 = vector.shape_cast %125 : vector<1x8x32xf32> to vector<8x32xf32>
    %127 = vector.shape_cast %124 : vector<8x32xf32> to vector<1x8x32xf32>
    tpu.vector_store %arg10[%c0_48, %c0_49, %c0_50], %127 {strides = array<i32>} : memref<1x8x32xf32, #tpu.memory_space<vmem>>, vector<1x8x32xf32>,
    return
  }
  func.func @transform_0(%arg0: i32) -> (i32, i32, i32) {
    %c0_i32 = arith.constant 0 : i32
    %c0_i32_0 = arith.constant 0 : i32
    %c0_i32_1 = arith.constant 0 : i32
    return %arg0, %c0_i32, %c0_i32_0 : i32, i32, i32
  }
  func.func @transform_1(%arg0: i32) -> (i32, i32) {
    %c0_i32 = arith.constant 0 : i32
    %c0_i32_0 = arith.constant 0 : i32
    %c0_i32_1 = arith.constant 0 : i32
    return %c0_i32, %c0_i32_0 : i32, i32
  }
  func.func @transform_2(%arg0: i32) -> (i32, i32) {
    %c0_i32 = arith.constant 0 : i32
    %c0_i32_0 = arith.constant 0 : i32
    %c0_i32_1 = arith.constant 0 : i32
    return %c0_i32, %c0_i32_0 : i32, i32
  }
  func.func @transform_3(%arg0: i32) -> (i32, i32) {
    %c0_i32 = arith.constant 0 : i32
    %c0_i32_0 = arith.constant 0 : i32
    %c0_i32_1 = arith.constant 0 : i32
    return %c0_i32, %c0_i32_0 : i32, i32
  }
  func.func @transform_4(%arg0: i32) -> (i32, i32) {
    %c0_i32 = arith.constant 0 : i32
    %c0_i32_0 = arith.constant 0 : i32
    %c0_i32_1 = arith.constant 0 : i32
    return %c0_i32, %c0_i32_0 : i32, i32
  }
  func.func @transform_5(%arg0: i32) -> (i32, i32) {
    %c0_i32 = arith.constant 0 : i32
    %c0_i32_0 = arith.constant 0 : i32
    %c0_i32_1 = arith.constant 0 : i32
    return %c0_i32, %c0_i32_0 : i32, i32
  }
  func.func @transform_6(%arg0: i32) -> (i32, i32) {
    %c0_i32 = arith.constant 0 : i32
    %c0_i32_0 = arith.constant 0 : i32
    %c0_i32_1 = arith.constant 0 : i32
    return %c0_i32, %c0_i32_0 : i32, i32
  }
  func.func @transform_7(%arg0: i32) -> (i32, i32) {
    %c0_i32 = arith.constant 0 : i32
    %c0_i32_0 = arith.constant 0 : i32
    %c0_i32_1 = arith.constant 0 : i32
    return %c0_i32, %c0_i32_0 : i32, i32
  }
  func.func @transform_8(%arg0: i32) -> (i32, i32) {
    %c0_i32 = arith.constant 0 : i32
    %c0_i32_0 = arith.constant 0 : i32
    %c0_i32_1 = arith.constant 0 : i32
    return %c0_i32, %c0_i32_0 : i32, i32
  }
  func.func @transform_9(%arg0: i32) -> (i32, i32, i32) {
    %c0_i32 = arith.constant 0 : i32
    %c0_i32_0 = arith.constant 0 : i32
    %c0_i32_1 = arith.constant 0 : i32
    return %arg0, %c0_i32, %c0_i32_0 : i32, i32, i32
  }
}

</mosaic_0001>

<bundles_post_ra>
// kernel: block_recurrent_transformer_forward.11
= control target key start
LH: loop header
LB: loop body
LE: loop exit
PB: predicated region body
PF: predicated region fallthrough
CT: control target
= control target key end

     0   :  { %vm30_vm0 = vcmask 261120   ;;  %vm19_vm1 = vcmask 408576   ;;  %v205_v6 = vmov 0.0   ;;  %s270_s0 = inlined_call_operand.vmem [shape: f32[16,32], index: 0, kind: input, shape index: {}]   ;;  %s271_s1 = inlined_call_operand.vmem [shape: f32[32,50], index: 1, kind: input, shape index: {}]   ;;  %s272_s2 = inlined_call_operand.vmem [shape: f32[1,50], index: 2, kind: input, shape index: {}]   ;;  %s273_s3 = inlined_call_operand.hbm [shape: f32[16,50], index: 3, kind: output, shape index: {}]  }
   0x1   :  { %v26_v0 = vld [vmem:[%s271_s1] sm:$0xff]  ;;  %v27_v1 = vld [vmem:[%s271_s1 + $0x8] sm:$0xff]  ;;  %v28_v2 = vld [vmem:[%s271_s1 + $0x10] sm:$0xff]  ;;  %21 = vst.msk [vmem:[#allocation2 + $0x8] sm:$0xff] %vm19_vm1, %v205_v6 }
   0x2   :  { %v169_v3 = vpack.c.bf16 %v27_v1, %v26_v0  ;;  %v29_v4 = vld [vmem:[%s271_s1 + $0x18] sm:$0xff]  ;;  %v24_v5 = vld [vmem:[%s270_s0] sm:$0xff]  ;;  %20 = vst.msk [vmem:[#allocation2] sm:$0xff] %vm19_vm1, %v205_v6 }
   0x3   :  { %v173_v7 = vpack.c.bf16 %v29_v4, %v28_v2  ;;  %166 = vmatprep.mubr.msk.f32.mxu0 %vm30_vm0, %v24_v5 }
   0x4   :  { %8 = vsyncpa [#allocation4], 0  ;;  %170 = vmatprep.subr.bf16.mxu0 %v169_v3  ;;  %v25_v8 = vld [vmem:[%s270_s0 + $0x8] sm:$0xff]  ;;  %v151_v15 = vld [vmem:[%s272_s2] ss:$0 sm:$0xff]  ;;  %s206_s25 = smov [#allocation3]  }
   0x5   :  { %172 = vmatpush3.bf16.msra.mxu0 %v169_v3  ;;  %s138_s26 = sshll.u32 %s206_s25, 4  ;;  %s139_s26 = int_to_ptr.vmem [resolvable:$true] %s138_s26 }
   0x6   :  { %174 = vmatprep.subr.bf16.mxu0 %v173_v7  ;;  %s181_s0 = scalar_lea.vmem %s139_s26, 256  ;;  %p186_p1 = scmp.lt.s32.totalorder %s139_s26, %s139_s26 }
   0x7   :  { %p182_p0 = scmp.ne.s32.totalorder %s139_s26, %s181_s0  ;;  %p187_p2 = scmp.lt.s32.totalorder %s181_s0, %s181_s0 }
   0x8   :  { %v23_v9 = vld [vmem:[#allocation2 + $0x8] sm:$0xff] }
   0x9   :  { %176 = vmatpush3.bf16.msra.mxu0 %v173_v7  ;;  %v22_v10 = vld [vmem:[#allocation2] sm:$0xff]  ;;  %p188_p3 = por %p187_p2, %p186_p1 }
   0xb   :  { %p189_p4 = pnand %p188_p3, %p182_p0 }
   0xc   :  { %167 = vmatmul.mubr.msk.f32.vlgmr.msra.gmra.mrb[0].mxu0 %vm30_vm0, %v25_v8 }
  0xdf   :  { %v168_v11 = vpop.f32.mrb[0].mxu0 }
  0xe0   :  { %v113_v12 = vadd.f32 %v168_v11, %v23_v9  ;;  %v103_v13 = vpop.f32.mrb[1].mxu0 }
  0xe1   :  { %v112_v14 = vadd.f32 %v103_v13, %v22_v10 }
  0xe2   :  { %116 = vst.msk [vmem:[#allocation2 + $0x8] sm:$0xff] %vm19_vm1, %v113_v12 }
  0xe3   :  { %115 = vst.msk [vmem:[#allocation2] sm:$0xff] %vm19_vm1, %v112_v14 }
  0xe9   :  { %v121_v16 = vld [vmem:[#allocation2 + $0x8] sm:$0xff] }
  0xea   :  { %v120_v17 = vld [vmem:[#allocation2] sm:$0xff]  ;;  %v130_v18 = vadd.f32 %v151_v15, %v121_v16 }
  0xeb   :  { %v129_v19 = vadd.f32 %v151_v15, %v120_v17 }
  0xec   :  { %132 = vst.msk [vmem:[#allocation3 + $0x8] sm:$0xff] %vm19_vm1, %v130_v18 }
  0xed   :  { %131 = vst.msk [vmem:[#allocation3] sm:$0xff] %vm19_vm1, %v129_v19 }
  0xee   :  { %192 = shalt.err (!%p189_p4)
}
  0xef   :  { %s193_s28 = scalar_lea.hbm %s273_s3, 256 }
  0xf0   :  { %p194_p5 = scmp.ne.s32.totalorder %s273_s3, %s193_s28  ;;  %p197_p6 = scmp.lt.u32.totalorder %s193_s28, %s273_s3 }
  0xf2   :  { %p199_p7 = pnand %p197_p6, %p194_p5 }
  0xf4   :  { %202 = shalt.err (!%p199_p7)
}
  0xf5   :  { %s207_s6 = smov 128   ;;  %s208_s7 = smov 8  }
  0xf6   :  { %144 = dma.vmem_to_hbm [thread:$0]  %s139_s26, 256, %s273_s3, [#allocation4], %s207_s6, %s207_s6, %s208_s7  }
  0xf7   :  { %203 = dma.done.wait [#allocation4], 256  }
  0xf8   :  { %204 = vsyncadd [#allocation4], 4294967040 }
  0xf9   :  { %148 = vsyncpa [#allocation4], 1 }

// kernel: block_recurrent_transformer_forward.7
= control target key start
LH: loop header
LB: loop body
LE: loop exit
PB: predicated region body
PF: predicated region fallthrough
CT: control target
= control target key end

     0   :  { %vm30_vm0 = vcmask 261120   ;;  %vm199_vm1 = vcmask 523264   ;;  %s493_s0 = inlined_call_operand.vmem [shape: f32[16,32], index: 0, kind: input, shape index: {}]   ;;  %s494_s3 = inlined_call_operand.vmem [shape: f32[32,64], index: 3, kind: input, shape index: {}]   ;;  %s495_s1 = inlined_call_operand.vmem [shape: f32[1,32], index: 1, kind: input, shape index: {}]   ;;  %s496_s2 = inlined_call_operand.vmem [shape: f32[1,32], index: 2, kind: input, shape index: {}]   ;;  %s497_s5 = inlined_call_operand.vmem [shape: f32[64,32], index: 5, kind: input, shape index: {}]   ;;  %s498_s4 = inlined_call_operand.vmem [shape: f32[1,64], index: 4, kind: input, shape index: {}]   ;;  %s499_s6 = inlined_call_operand.vmem [shape: f32[1,32], index: 6, kind: input, shape index: {}]   ;;  %s500_s7 = inlined_call_operand.vmem [shape: f32[16,32], index: 7, kind: output, shape index: {}]  }
   0x1   :  { %v418_v0 = vld [vmem:[%s493_s0] sm:$0xff]  ;;  %v423_v1 = vld [vmem:[%s493_s0 + $0x8] sm:$0xff]  ;;  %v76_v16 = vld [vmem:[%s494_s3 + $0x10] sm:$0xff] }
   0x2   :  { %v31_v2 = vsel %vm30_vm0, %v418_v0, 0.0  ;;  %v34_v3 = vsel %vm30_vm0, %v423_v1, 0.0  ;;  %v74_v14 = vld [vmem:[%s494_s3] sm:$0xff]  ;;  %v75_v15 = vld [vmem:[%s494_s3 + $0x8] sm:$0xff]  ;;  %v77_v18 = vld [vmem:[%s494_s3 + $0x18] sm:$0xff] }
   0x3   :  { %32 = vadd.xlane.f32.xlu0 %v31_v2  ;;  %v343_v17 = vpack.c.bf16 %v75_v15, %v74_v14  ;;  %v347_v19 = vpack.c.bf16 %v77_v18, %v76_v16  ;;  %v289_v27 = vld [vmem:[%s495_s1] ss:$0 sm:$0xff]  ;;  %v185_v37 = vld [vmem:[%s497_s5 + $0x8] sm:$0xff]  ;;  %v186_v38 = vld [vmem:[%s497_s5 + $0x10] sm:$0xff] }
   0x4   :  { %v290_v29 = vld [vmem:[%s496_s2] ss:$0 sm:$0xff]  ;;  %v187_v40 = vld [vmem:[%s497_s5 + $0x18] sm:$0xff]  ;;  %v189_v43 = vld [vmem:[%s497_s5 + $0x28] sm:$0xff] }
   0x5   :  { %344 = vmatprep.subr.bf16.mxu0 %v343_v17  ;;  %v184_v36 = vld [vmem:[%s497_s5] sm:$0xff]  ;;  %v355_v41 = vpack.c.bf16 %v187_v40, %v186_v38  ;;  %v190_v45 = vld [vmem:[%s497_s5 + $0x30] sm:$0xff]  ;;  %v191_v46 = vld [vmem:[%s497_s5 + $0x38] sm:$0xff] }
   0x6   :  { %346 = vmatpush3.bf16.msra.mxu0 %v343_v17  ;;  %v351_v39 = vpack.c.bf16 %v185_v37, %v184_v36  ;;  %v188_v42 = vld [vmem:[%s497_s5 + $0x20] sm:$0xff]  ;;  %v363_v47 = vpack.c.bf16 %v191_v46, %v190_v45 }
   0x7   :  { %35 = vadd.xlane.f32.xlu0 %v34_v3  ;;  %348 = vmatprep.subr.bf16.mxu0 %v347_v19  ;;  %v359_v44 = vpack.c.bf16 %v189_v43, %v188_v42  ;;  %v291_v48 = vld [vmem:[%s498_s4] ss:$0 sm:$0xff] }
   0x8   :  { %352 = vmatprep.subr.bf16.mxu1 %v351_v39 }
   0x9   :  { %354 = vmatpush3.bf16.msra.mxu1 %v351_v39 }
   0xa   :  { %350 = vmatpush3.bf16.msra.mxu0 %v347_v19  ;;  %356 = vmatprep.subr.bf16.mxu1 %v355_v41 }
   0xd   :  { %358 = vmatpush3.bf16.msra.mxu1 %v355_v41 }
   0xe   :  { %360 = vmatprep.subr.bf16.mxu1 %v359_v44 }
  0x11   :  { %362 = vmatpush3.bf16.msra.mxu1 %v359_v44 }
  0x12   :  { %364 = vmatprep.subr.bf16.mxu1 %v363_v47 }
  0x15   :  { %366 = vmatpush3.bf16.msra.mxu1 %v363_v47 }
  0x90   :  { %v33_v4 = vpop.xlane.xlu0 %32 }
  0x91   :  { %v38_v5 = vmul.f32 0.03125, %v33_v4 }
  0x93   :  { %v40_v6 = vsub.f32 %v418_v0, %v38_v5 }
  0x94   :  { %v36_v7 = vpop.xlane.xlu0 %35 }
  0x95   :  { %v39_v8 = vmul.f32 0.03125, %v36_v7  ;;  %v42_v9 = vmul.f32 %v40_v6, %v40_v6 }
  0x97   :  { %v41_v10 = vsub.f32 %v423_v1, %v39_v8  ;;  %v44_v11 = vsel %vm30_vm0, %v42_v9, 0.0  ;;  %v294_v9 = vld [vmem:[%s499_s6] ss:$0 sm:$0xff] }
  0x98   :  { %45 = vadd.xlane.f32.xlu1 %v44_v11 }
  0x99   :  { %v43_v12 = vmul.f32 %v41_v10, %v41_v10 }
  0x9b   :  { %v47_v13 = vsel %vm30_vm0, %v43_v12, 0.0 }
  0x9c   :  { %48 = vadd.xlane.f32.xlu1 %v47_v13 }
 0x125   :  { %v46_v20 = vpop.xlane.xlu1 %45 }
 0x126   :  { %v50_v21 = vmul.f32 0.03125, %v46_v20 }
 0x128   :  { %v52_v22 = vadd.f32 1e-05, %v50_v21 }
 0x129   :  { %v49_v23 = vpop.xlane.xlu1 %48 }
 0x12a   :  { %367 = vrsqrt.f32 %v52_v22  ;;  %v51_v24 = vmul.f32 0.03125, %v49_v23 }
 0x12c   :  { %v53_v25 = vadd.f32 1e-05, %v51_v24 }
 0x12e   :  { %369 = vrsqrt.f32 %v53_v25 }
 0x134   :  { %v368_v26 = vpop.eup %367 }
 0x135   :  { %v56_v28 = vmul.f32 %v368_v26, %v40_v6 }
 0x137   :  { %v64_v30 = vmul.f32 %v289_v27, %v56_v28 }
 0x138   :  { %v370_v31 = vpop.eup %369 }
 0x139   :  { %v57_v32 = vmul.f32 %v370_v31, %v41_v10  ;;  %v72_v33 = vadd.f32 %v290_v29, %v64_v30 }
 0x13b   :  { %v65_v34 = vmul.f32 %v289_v27, %v57_v32  ;;  %321 = vmatprep.mubr.msk.f32.mxu0 %vm30_vm0, %v72_v33 }
 0x13d   :  { %v73_v35 = vadd.f32 %v290_v29, %v65_v34 }
 0x13f   :  { %322 = vmatmul.mubr.msk.f32.vlgmr.msra.gmra.mrb[0].mxu0 %vm30_vm0, %v73_v35 }
 0x212   :  { %v323_v49 = vpop.f32.mrb[0].mxu0 }
 0x213   :  { %v163_v50 = vadd.f32 %v323_v49, %v291_v48  ;;  %v157_v51 = vpop.f32.mrb[1].mxu0 }
 0x214   :  { %v158_v52 = vadd.f32 %v291_v48, %v157_v51 }
 0x215   :  { %v167_v53 = vmul.f32 %v163_v50, %v163_v50 }
 0x216   :  { %v166_v54 = vmul.f32 %v158_v52, %v158_v52 }
 0x217   :  { %v169_v55 = vmul.f32 %v167_v53, %v163_v50 }
 0x218   :  { %v168_v56 = vmul.f32 %v166_v54, %v158_v52 }
 0x219   :  { %v171_v57 = vmul.f32 0.044715, %v169_v55 }
 0x21a   :  { %v170_v58 = vmul.f32 0.044715, %v168_v56 }
 0x21b   :  { %v173_v59 = vadd.f32 %v171_v57, %v163_v50 }
 0x21c   :  { %v172_v60 = vadd.f32 %v170_v58, %v158_v52 }
 0x21d   :  { %v175_v61 = vmul.f32 0.7978846, %v173_v59 }
 0x21e   :  { %v174_v62 = vmul.f32 0.7978846, %v172_v60 }
 0x21f   :  { %371 = vtanh.f32 %v175_v61 }
 0x220   :  { %373 = vtanh.f32 %v174_v62 }
 0x229   :  { %v372_v63 = vpop.eup %371 }
 0x22a   :  { %v374_v2 = vpop.eup %373  ;;  %v179_v3 = vadd.f32 1.0, %v372_v63 }
 0x22b   :  { %v178_v4 = vadd.f32 1.0, %v374_v2 }
 0x22c   :  { %v181_v5 = vmul.f32 0.5, %v179_v3 }
 0x22d   :  { %v180_v6 = vmul.f32 0.5, %v178_v4 }
 0x22e   :  { %v183_v8 = vmul.f32 %v181_v5, %v163_v50 }
 0x22f   :  { %v182_v7 = vmul.f32 %v180_v6, %v158_v52 }
 0x231   :  { %340 = vmatprep.mubr.msk.f32.mxu1 %vm199_vm1, %v182_v7 }
 0x232   :  { %341 = vmatmul.mubr.msk.f32.vlgmr.msra.gmra.mrb[0].mxu1 %vm199_vm1, %v183_v8 }
 0x305   :  { %v342_v10 = vpop.f32.mrb[0].mxu1 }
 0x306   :  { %v278_v11 = vadd.f32 %v342_v10, %v294_v9  ;;  %v272_v12 = vpop.f32.mrb[1].mxu1 }
 0x307   :  { %v273_v13 = vadd.f32 %v294_v9, %v272_v12 }
 0x308   :  { %v282_v14 = vadd.f32 %v278_v11, %v423_v1 }
 0x309   :  { %v281_v15 = vadd.f32 %v273_v13, %v418_v0 }
 0x30a   :  { %284 = vst.msk [vmem:[%s500_s7 + $0x8] sm:$0xff] %vm30_vm0, %v282_v14 }
 0x30b   :  { %283 = vst.msk [vmem:[%s500_s7] sm:$0xff] %vm30_vm0, %v281_v15 }

// kernel: block_recurrent_transformer_forward.6
= control target key start
LH: loop header
LB: loop body
LE: loop exit
PB: predicated region body
PF: predicated region fallthrough
CT: control target
= control target key end

     0   :  { %s1610_s30 = smov 0   ;;  %s1794_s0 = inlined_call_operand.vmem [shape: f32[2,8,32], index: 0, kind: input, shape index: {}]   ;;  %s1795_s1 = inlined_call_operand.vmem [shape: f32[1,32], index: 1, kind: input, shape index: {}]   ;;  %s1796_s2 = inlined_call_operand.vmem [shape: f32[1,32], index: 2, kind: input, shape index: {}]   ;;  %s1797_s3 = inlined_call_operand.vmem [shape: f32[32,96], index: 3, kind: input, shape index: {}]   ;;  %s1798_s4 = inlined_call_operand.vmem [shape: f32[1,96], index: 4, kind: input, shape index: {}]   ;;  %s1799_s5 = inlined_call_operand.vmem [shape: f32[32,32], index: 5, kind: input, shape index: {}]   ;;  %s1800_s6 = inlined_call_operand.vmem [shape: f32[1,32], index: 6, kind: input, shape index: {}]   ;;  %s1801_s7 = inlined_call_operand.vmem [shape: f32[8,16], index: 7, kind: input, shape index: {}]   ;;  %s1802_s8 = inlined_call_operand.vmem [shape: f32[8,16], index: 8, kind: input, shape index: {}]   ;;  %s1803_s9 = inlined_call_operand.vmem [shape: f32[2,8,32], index: 9, kind: output, shape index: {}]  }
   0x1 LB: > { %s1346_s10 = sadd.s32 4294967295, %s1545_s30   ;;  %p1350_p0 = scmp.ge.s32.totalorder %s1545_s30, 1  ;;  %s1545_s30 = sphi %s1610_s30, %s19_s30  }
   0x2   : > { %p286_p1 = scmp.lt.s32.totalorder %s1545_s30, 3 }
   0x4   : > { %p287_p2 = pnand %p1350_p0, %p286_p1 }
   0x5   : > { %p320_p3 = scmp.lt.s32.totalorder (!%p287_p2), %s1346_s10, 1  ;;  %vm331_vm0 = vcmask (!%p287_p2), 261120   ;;  %v360_v7 = vld [vmem:[%s1797_s3] sm:$0xff] (!%p287_p2)  ;;  %v361_v8 = vld [vmem:[%s1797_s3 + $0x8] sm:$0xff] (!%p287_p2)  ;;  %v362_v9 = vld [vmem:[%s1797_s3 + $0x10] sm:$0xff] (!%p287_p2)  ;;  %v1547_v10 = vmov (!%p287_p2), 0.0|0.0   ;;  %v451_v24 = vlaneseq (!%p287_p2) }
   0x6   : > { %290 = sbr.rel (%p287_p2) target bundleno = 2739 (0xab3), region = 56  ;;  %1480 = vmatprep.subr.bf16.mxu0 (!%p287_p2), %v1547_v10  ;;  %v1481_v11 = vpack.c.bf16 (!%p287_p2), %v361_v8, %v360_v7  ;;  %v363_v12 = vld [vmem:[%s1797_s3 + $0x18] sm:$0xff] (!%p287_p2)  ;;  %vm1548_vm1 = vmmov (!%p287_p2), 0   ;;  %v1549_v13 = vmov (!%p287_p2), 0.0   ;;  %1486 = vmatprep.subr.bf16.mxu1 (!%p287_p2), %v1547_v10  ;;  %v1353_v19 = vld [vmem:[%s1795_s1] ss:$0 sm:$0xff] (!%p287_p2) }
   0x7   : > { %1415 = vmatprep.mubr.msk.f32.mxu0 (!%p287_p2), %vm1548_vm1, %v1549_v13  ;;  %1422 = vmatprep.mubr.msk.f32.mxu1 (!%p287_p2), %vm1548_vm1, %v1549_v13  ;;  %v1484_v14 = vpack.c.bf16 (!%p287_p2), %v363_v12, %v362_v9  ;;  %v1354_v21 = vld [vmem:[%s1796_s2] ss:$0 sm:$0xff] (!%p287_p2)  ;;  %v1661_v25 = vshrl.u32 (!%p287_p2), %v451_v24, 7  ;;  %v1664_v27 = vand.u32 (!%p287_p2), 127, %v451_v24  ;;  %v1550_v33 = vmov (!%p287_p2), 1.0   ;;  %s1552_s29 = smov (!%p287_p2), 96  }
   0x8   : > { %1482 = vmatpush3.bf16.msra.mxu0 (!%p287_p2), %v1481_v11  ;;  %vm1551_vm5 = vmmov (!%p287_p2), 1   ;;  %v1355_v36 = vld [vmem:[%s1798_s4] ss:$0 sm:$0xff] (!%p287_p2)  ;;  %vm474_vm7 = vcmask (!%p287_p2), 130048   ;;  %s1554_s17 = smov (!%p287_p2), 64   ;;  %s1555_s18 = smov (!%p287_p2), 80  }
   0x9   : > { %1483 = vmatprep.subr.bf16.mxu0 (!%p287_p2), %v1547_v10  ;;  %v453_v26 = vadd.s32 (!%p287_p2), 8, %v1661_v25  ;;  %v456_v28 = vadd.s32 (!%p287_p2), 8, %v1664_v27  ;;  %v444_v40 = vld [vmem:[%s1801_s7] sm:$0xff] (!%p287_p2)  ;;  %s1556_s19 = smov (!%p287_p2), 112   ;;  %s1557_s20 = smov (!%p287_p2), 48   ;;  %vm468_vm8 = vcmp.le.s32.totalorder (!%p287_p2), %v1664_v27, %v1661_v25  ;;  %vm714_vm9 = vcmask (!%p287_p2), 64512  }
   0xa   : > { %v1705_v44 = vld [vmem:[%s1802_s8] sm:$0xff] (!%p287_p2)  ;;  %s1558_s21 = smov (!%p287_p2), 16   ;;  %v1559_v60 = vmov (!%p287_p2), -1e+09  }
   0xb   : > { %v461_v29 = vadd.s32 (!%p287_p2), 8, %v453_v26  ;;  %vm458_vm2 = vcmp.eq.s32.totalorder (!%p287_p2), %v453_v26, %v456_v28  ;;  %vm462_vm4 = vcmp.eq.s32.totalorder (!%p287_p2), %v453_v26, %v1664_v27  ;;  %v472_v61 = vsel (!%p287_p2), %vm468_vm8, 0.0, %v1559_v60 }
   0xc   : > { %1485 = vmatpush3.bf16.msra.mxu0 (!%p287_p2), %v1484_v14  ;;  %v460_v30 = vsel (!%p287_p2), %vm458_vm2, -1.0, %v1549_v13  ;;  %vm1673_vm6 = vmpackc.low (!%p287_p2), %vm1551_vm5, %vm462_vm4 }
   0xd   : > { %s1807_s10 = smov (!%p320_p3, %s1346_s10), 1  ;;  %1432 = vmatprep.subr.mxu0 %v1549_v13  ;;  %vm463_vm3 = vcmp.eq.s32.totalorder %v461_v29, %v1664_v27 }
   0xe   : > { %s1351_s11 = sshll.u32 %s1807_s10, 3  ;;  %v465_v31 = vsel %vm463_vm3, 1.0, %v1549_v13 }
   0xf   : > { %s323_s14 = scalar_lea.vmem %s1794_s0, %s1351_s11  ;;  %v467_v32 = vadd.f32 %v465_v31, %v460_v30  ;;  %s327_s16 = scalar_lea.vmem %s1803_s9, %s1351_s11 }
  0x10   : > { %v1626_v0 = vld [vmem:[%s323_s14] sm:$0xff]  ;;  %s1553_s14 = smov 32  }
  0x11   : > { %v332_v1 = vsel %vm331_vm0, %v1626_v0, 0.0  ;;  %v1671_v34 = vpack.c.bf16 %v467_v32, %v1550_v33 }
  0x12   : > { %333 = vadd.xlane.f32.xlu0 %v332_v1 }
  0x13   : > { %1489 = vmatpush3.bf16.msk.msra.mxu1 %vm1673_vm6, %v1671_v34 }
  0x14   : > { %1490 = vmatprep.subr.bf16.mxu1 %v1547_v10 }
  0x9f   : > { %v334_v2 = vpop.xlane.xlu0 %333 }
  0xa0   : > { %v336_v3 = vmul.f32 0.03125, %v334_v2 }
  0xa2   : > { %v337_v4 = vsub.f32 %v1626_v0, %v336_v3 }
  0xa4   : > { %v338_v5 = vmul.f32 %v337_v4, %v337_v4 }
  0xa6   : > { %v339_v6 = vsel %vm331_vm0, %v338_v5, 0.0 }
  0xa7   : > { %340 = vadd.xlane.f32.xlu0 %v339_v6 }
 0x134   : > { %v341_v15 = vpop.xlane.xlu0 %340 }
 0x135   : > { %v342_v16 = vmul.f32 0.03125, %v341_v15 }
 0x137   : > { %v343_v17 = vadd.f32 1e-05, %v342_v16 }
 0x139   : > { %1529 = vrsqrt.f32 %v343_v17 }
 0x143   : > { %v1530_v18 = vpop.eup %1529 }
 0x144   : > { %v345_v20 = vmul.f32 %v1530_v18, %v337_v4 }
 0x146   : > { %v352_v22 = vmul.f32 %v1353_v19, %v345_v20 }
 0x148   : > { %v359_v23 = vadd.f32 %v1354_v21, %v352_v22 }
 0x14a   : > { %1416 = vmatmul.mubr.msk.f32.vlgmr.msra.gmra.mrb[0].mxu0 %vm331_vm0, %v359_v23 }
 0x14b   : > { %1434 = vmatprep.mubr.msk.f32.mxu0 %vm1548_vm1, %v1549_v13 }
 0x21d   : > { %v440_v37 = vpop.f32.mrb[0].mxu0 }
 0x21e   : > { %v1684_v38 = vadd.f32 %v1355_v36, %v440_v37  ;;  %v1417_v39 = vpop.f32.mrb[1].mxu0 }
 0x220   : > { %556 = vrot.lane.b32.xlu1 %v1684_v38, %s1552_s29  ;;  %1423 = vmatmul.mubr.msk.f32.vlgmr.msra.gmra.mrb[0].mxu1 %vm474_vm7, %v1684_v38  ;;  %v473_v54 = vmul.f32 %v444_v40, %v1684_v38 }
 0x221   : > { %1493 = vmatpush3.bf16.msk.msra.mxu1 %vm1673_vm6, %v1671_v34  ;;  %1429 = vmatprep.mubr.msk.f32.mxu1 %vm1548_vm1, %v1549_v13 }
 0x222   : > { %1437 = vmatprep.subr.mxu1 %v1549_v13 }
 0x224   : > { %552 = vrot.lane.b32.xlu1 %v444_v40, %s1553_s14 }
 0x292   : > { %v557_v41 = vpop.permute.xlu1 %556 }
 0x293   : > { %1430 = vmatmul.mubr.msk.f32.vlgmr.msra.gmra.mrb[2].mxu1 %vm474_vm7, %v557_v41 }
 0x294   : > { %1439 = vmatprep.mubr.msk.f32.mxu1 %vm1548_vm1, %v1549_v13 }
 0x296   : > { %v553_v48 = vpop.permute.xlu1 %552 }
 0x297   : > { %v555_v49 = vmul.f32 %v553_v48, %v1684_v38 }
 0x2f3   : > { %v544_v42 = vpop.f32.mrb[0].mxu1 }
 0x2f4   : > { %v1424_v43 = vpop.f32.mrb[1].mxu1  ;;  %v548_v53 = vmul.f32 %v544_v42, %v1705_v44 }
 0x2f6   : > { %v549_v55 = vadd.f32 %v548_v53, %v473_v54  ;;  %v1373_v53 = vld [vmem:[%s1800_s6] ss:$0 sm:$0xff] }
 0x2f8   : > { %v550_v58 = vmul.f32 0.25, %v549_v55 }
 0x366   : > { %v626_v45 = vpop.f32.mrb[2].mxu1 }
 0x367   : > { %v630_v46 = vmul.f32 %v626_v45, %v1705_v44  ;;  %v1431_v47 = vpop.f32.mrb[3].mxu1  ;;  %v449_v45 = vld [vmem:[%s1799_s5 + $0x18] sm:$0xff] }
 0x369   : > { %632 = vrot.lane.b32.xlu0 %v630_v46, %s1553_s14 }
 0x36d   : > { %724 = vrot.lane.b32.xlu0 %v1684_v38, %s1554_s17 }
 0x371   : > { %891 = vrot.lane.b32.xlu0 %v1684_v38, %s1555_s18 }
 0x375   : > { %806 = vrot.lane.b32.xlu0 %v1684_v38, %s1556_s19 }
 0x379   : > { %887 = vrot.lane.b32.xlu0 %v444_v40, %s1557_s20 }
 0x37d   : > { %802 = vrot.lane.b32.xlu0 %v444_v40, %s1558_s21 }
 0x3db   : > { %v633_v50 = vpop.permute.xlu0 %632 }
 0x3dc   : > { %v635_v51 = vadd.f32 %v633_v50, %v555_v49 }
 0x3de   : > { %637 = vrot.lane.b32.xlu1 %v635_v51, %s1552_s29 }
 0x3df   : > { %v725_v52 = vpop.permute.xlu0 %724 }
 0x3e0   : > { %1438 = vmatpush3.msra.mxu1 %v725_v52 }
 0x3e1   : > { %1498 = vmatprep.subr.bf16.mxu1 %v1547_v10 }
 0x3e3   : > { %v892_v57 = vpop.permute.xlu0 %891 }
 0x3e7   : > { %v807_v59 = vpop.permute.xlu0 %806 }
 0x3eb   : > { %v888_v18 = vpop.permute.xlu0 %887 }
 0x3ec   : > { %v890_v21 = vmul.f32 %v888_v18, %v1684_v38 }
 0x3ef   : > { %v803_v19 = vpop.permute.xlu0 %802 }
 0x3f0   : > { %v805_v22 = vmul.f32 %v803_v19, %v1684_v38 }
 0x450   : > { %v638_v56 = vpop.permute.xlu1 %637 }
 0x451   : > { %1433 = vmatpush3.xpose.msk.msra.mxu0 %vm474_vm7, %v638_v56 }
 0x452   : > { %1494 = vmatprep.subr.bf16.mxu0 %v1547_v10 }
 0x454   : > { %1435 = vmatmul.mubr.msk.f32.vlgmr.msra.gmra.mrb[2].mxu0 %vm474_vm7, %v550_v58 }
 0x455   : > { %1497 = vmatpush3.bf16.msk.msra.mxu0 %vm1673_vm6, %v1671_v34  ;;  %1446 = vmatprep.mubr.msk.f32.mxu0 %vm1548_vm1, %v1549_v13 }
 0x456   : > { %1456 = vmatprep.subr.mxu0 %v1549_v13 }
 0x458   : > { %1447 = vmatmul.mubr.msk.f32.vlgmr.msra.gmra.mrb[4].mxu0 %vm474_vm7, %v807_v59 }
 0x459   : > { %1458 = vmatprep.mubr.msk.f32.mxu0 %vm1548_vm1, %v1549_v13 }
 0x527   : > { %v710_v62 = vpop.f32.mrb[2].mxu0 }
 0x528   : > { %v711_v63 = vadd.f32 %v710_v62, %v472_v61  ;;  %v1436_v1 = vpop.f32.mrb[3].mxu0 }
 0x52a   : > { %v715_v2 = vsel %vm714_vm9, %v711_v63, -inf }
 0x52b   : > { %716 = vmax.xlane.f32.xlu1 %v715_v2  ;;  %v876_v3 = vpop.f32.mrb[4].mxu0 }
 0x52c   : > { %v880_v4 = vmul.f32 %v876_v3, %v1705_v44  ;;  %v1448_v5 = vpop.f32.mrb[5].mxu0 }
 0x52e   : > { %882 = vrot.lane.b32.xlu0 %v880_v4, %s1558_s21 }
 0x5a0   : > { %v883_v20 = vpop.permute.xlu0 %882 }
 0x5a1   : > { %v885_v24 = vadd.f32 %v883_v20, %v805_v22 }
 0x5a3   : > { %v886_v27 = vmul.f32 0.25, %v885_v24 }
 0x5b8   : > { %v717_v6 = vpop.xlane.xlu1 %716 }
 0x5b9   : > { %v718_v7 = vsub.f32 %v711_v63, %v717_v6 }
 0x5bb   : > { %v719_v8 = vmul.f32 1.442695, %v718_v7 }
 0x5bd   : > { %1531 = vpow2.f32 %v719_v8 }
 0x5c7   : > { %v1532_v9 = vpop.eup %1531 }
 0x5c8   : > { %1440 = vmatmul.mubr.msk.f32.vlgmr.msra.gmra.mrb[4].mxu1 %vm714_vm9, %v1532_v9  ;;  %v721_v17 = vsel %vm714_vm9, %v1532_v9, 0.0 }
 0x5c9   : > { %1501 = vmatpush3.bf16.msk.msra.mxu1 %vm1673_vm6, %v1671_v34  ;;  %1453 = vmatprep.mubr.msk.f32.mxu1 %vm1548_vm1, %v1549_v13 }
 0x5ca   : > { %1461 = vmatprep.subr.mxu1 %v1549_v13 }
 0x5cc   : > { %1454 = vmatmul.mubr.msk.f32.vlgmr.msra.gmra.mrb[6].mxu1 %vm474_vm7, %v892_v57 }
 0x5cd   : > { %1463 = vmatprep.mubr.msk.f32.mxu1 %vm1548_vm1, %v1549_v13 }
 0x69b   : > { %v796_v11 = vpop.f32.mrb[4].mxu1 }
 0x69c   : > { %v1441_v12 = vpop.f32.mrb[5].mxu1 }
 0x69f   : > { %v961_v14 = vpop.f32.mrb[6].mxu1 }
 0x6a0   : > { %v965_v15 = vmul.f32 %v961_v14, %v1705_v44  ;;  %v1455_v16 = vpop.f32.mrb[7].mxu1  ;;  %v448_v44 = vld [vmem:[%s1799_s5 + $0x10] sm:$0xff] }
 0x6a1   : > { %v1503_v46 = vpack.c.bf16 %v449_v45, %v448_v44 }
 0x6a2   : > { %967 = vrot.lane.b32.xlu1 %v965_v15, %s1557_s20 }
 0x6a6   : > { %1060 = vrot.lane.b32.xlu1 %v1684_v38, %s1557_s20  ;;  %v447_v38 = vld [vmem:[%s1799_s5 + $0x8] sm:$0xff] }
 0x6ca   : > { %722 = vadd.xlane.f32.xlu1 %v721_v17 }
 0x714   : > { %v968_v23 = vpop.permute.xlu1 %967 }
 0x715   : > { %v970_v25 = vadd.f32 %v968_v23, %v890_v21 }
 0x717   : > { %975 = vrot.lane.b32.xlu0 %v970_v25, %s1555_s18 }
 0x718   : > { %v1061_v26 = vpop.permute.xlu1 %1060 }
 0x719   : > { %1462 = vmatpush3.msra.mxu1 %v1061_v26 }
 0x71a   : > { %1505 = vmatprep.subr.bf16.mxu1 %v1547_v10 }
 0x71b   : > { %972 = vrot.lane.b32.xlu0 %v886_v27, %s1556_s19 }
 0x757   : > { %v723_v35 = vpop.xlane.xlu1 %722 }
 0x758   : > { %1533 = vrcp.f32 %v723_v35 }
 0x762   : > { %v1534_v40 = vpop.eup %1533 }
 0x763   : > { %v801_v43 = vmul.f32 %v1534_v40, %v796_v11 }
 0x789   : > { %v976_v28 = vpop.permute.xlu0 %975 }
 0x78a   : > { %1457 = vmatpush3.xpose.msk.msra.mxu0 %vm474_vm7, %v976_v28 }
 0x78b   : > { %1502 = vmatprep.subr.bf16.mxu0 %v1547_v10  ;;  %v446_v10 = vld [vmem:[%s1799_s5] sm:$0xff] }
 0x78c   : > { %v1506_v39 = vpack.c.bf16 %v447_v38, %v446_v10 }
 0x78d   : > { %v973_v29 = vpop.permute.xlu0 %972 }
 0x78e   : > { %1459 = vmatmul.mubr.msk.f32.vlgmr.msra.gmra.mrb[6].mxu0 %vm474_vm7, %v973_v29 }
 0x78f   : > { %1470 = vmatprep.mubr.msk.f32.mxu0 %vm1548_vm1, %v1549_v13  ;;  %1504 = vmatpush3.bf16.msra.mxu0 %v1503_v46 }
 0x861   : > { %v1047_v30 = vpop.f32.mrb[6].mxu0 }
 0x862   : > { %v1048_v31 = vadd.f32 %v1047_v30, %v472_v61  ;;  %v1460_v32 = vpop.f32.mrb[7].mxu0 }
 0x864   : > { %v1051_v33 = vsel %vm714_vm9, %v1048_v31, -inf }
 0x865   : > { %1052 = vmax.xlane.f32.xlu0 %v1051_v33 }
 0x8f2   : > { %v1053_v34 = vpop.xlane.xlu0 %1052 }
 0x8f3   : > { %v1054_v36 = vsub.f32 %v1048_v31, %v1053_v34 }
 0x8f5   : > { %v1055_v37 = vmul.f32 1.442695, %v1054_v36 }
 0x8f7   : > { %1535 = vpow2.f32 %v1055_v37 }
 0x901   : > { %v1536_v41 = vpop.eup %1535 }
 0x902   : > { %1464 = vmatmul.mubr.msk.f32.vlgmr.msra.gmra.mrb[8].mxu1 %vm714_vm9, %v1536_v41  ;;  %v1057_v42 = vsel %vm714_vm9, %v1536_v41, 0.0 }
 0x903   : > { %1507 = vmatpush3.bf16.msra.mxu1 %v1506_v39  ;;  %1058 = vadd.xlane.f32.xlu0 %v1057_v42 }
 0x904   : > { %1477 = vmatprep.mubr.msk.f32.mxu1 %vm1548_vm1, %v1549_v13 }
 0x906   : > { %1478 = vmatmul.mubr.msk.f32.vlgmr.msra.gmra.mrb[10].mxu1 %vm474_vm7, %v801_v43 }
 0x990   : > { %v1059_v47 = vpop.xlane.xlu0 %1058 }
 0x991   : > { %1537 = vrcp.f32 %v1059_v47 }
 0x99b   : > { %v1538_v48 = vpop.eup %1537 }
 0x9d5   : > { %v1132_v49 = vpop.f32.mrb[8].mxu1 }
 0x9d6   : > { %v1137_v50 = vmul.f32 %v1538_v48, %v1132_v49  ;;  %v1465_v51 = vpop.f32.mrb[9].mxu1 }
 0x9d8   : > { %1471 = vmatmul.mubr.msk.f32.vlgmr.msra.gmra.mrb[8].mxu0 %vm474_vm7, %v1137_v50 }
 0x9d9   : > { %v1280_v13 = vpop.f32.mrb[10].mxu1 }
 0x9da   : > { %v1479_v52 = vpop.f32.mrb[11].mxu1 }
 0xaab   : > { %v1207_v54 = vpop.f32.mrb[8].mxu0 }
 0xaac   : > { %v1281_v55 = vadd.f32 %v1280_v13, %v1207_v54  ;;  %v1472_v56 = vpop.f32.mrb[9].mxu0 }
 0xaae   : > { %v1290_v57 = vadd.f32 %v1373_v53, %v1281_v55 }
 0xab0   : > { %v1291_v58 = vadd.f32 %v1290_v57, %v1626_v0 }
 0xab2   : > { %1292 = vst.msk [vmem:[%s327_s16] sm:$0xff] %vm331_vm0, %v1291_v58 }
 0xab3 PF: > { %s19_s30 = sadd.s32 1, %s1545_s30  }
 0xab4   : > { %p16_p4 = scmp.ge.s32.totalorder %s19_s30, 4  }
 0xab6   :  { %18 = sbr.rel (!%p16_p4) target bundleno = 1 (0x1), region = 86 }

// kernel: block_recurrent_transformer_forward.8
= control target key start
LH: loop header
LB: loop body
LE: loop exit
PB: predicated region body
PF: predicated region fallthrough
CT: control target
= control target key end

     0   :  { %s2211_s13 = smov 0   ;;  %s2433_s0 = inlined_call_operand.vmem [shape: f32[2,8,32], index: 0, kind: input, shape index: {}]   ;;  %s2434_s1 = inlined_call_operand.vmem [shape: f32[1,32], index: 1, kind: input, shape index: {}]   ;;  %s2435_s2 = inlined_call_operand.vmem [shape: f32[1,32], index: 2, kind: input, shape index: {}]   ;;  %s2436_s3 = inlined_call_operand.vmem [shape: f32[32,96], index: 3, kind: input, shape index: {}]   ;;  %s2437_s4 = inlined_call_operand.vmem [shape: f32[1,96], index: 4, kind: input, shape index: {}]   ;;  %s2438_s5 = inlined_call_operand.vmem [shape: f32[32,32], index: 5, kind: input, shape index: {}]   ;;  %s2439_s6 = inlined_call_operand.vmem [shape: f32[1,32], index: 6, kind: input, shape index: {}]   ;;  %s2440_s7 = inlined_call_operand.vmem [shape: f32[8,16], index: 7, kind: input, shape index: {}]   ;;  %s2441_s8 = inlined_call_operand.vmem [shape: f32[8,16], index: 8, kind: input, shape index: {}]   ;;  %s2442_s9 = inlined_call_operand.vmem [shape: f32[4,32], index: 9, kind: input, shape index: {}]   ;;  %s2443_s10 = inlined_call_operand.vmem [shape: f32[2,8,32], index: 10, kind: output, shape index: {}]  }
   0x1 LB: > { %s1848_s14 = sadd.s32 4294967295, %s2144_s13   ;;  %p1852_p0 = scmp.ge.s32.totalorder %s2144_s13, 1  ;;  %s2144_s13 = sphi %s2211_s13, %s20_s13  }
   0x2   : > { %p311_p1 = scmp.lt.s32.totalorder %s2144_s13, 3 }
   0x4   : > { %p312_p2 = pnand %p1852_p0, %p311_p1 }
   0x5   : > { %p347_p3 = scmp.lt.s32.totalorder (!%p312_p2), %s1848_s14, 1  ;;  %vm358_vm0 = vcmask (!%p312_p2), 261120   ;;  %v387_v2 = vld [vmem:[%s2436_s3] sm:$0xff] (!%p312_p2)  ;;  %v388_v3 = vld [vmem:[%s2436_s3 + $0x8] sm:$0xff] (!%p312_p2)  ;;  %v389_v4 = vld [vmem:[%s2436_s3 + $0x10] sm:$0xff] (!%p312_p2)  ;;  %s2146_s27 = smov (!%p312_p2), 96   ;;  %v641_v26 = vlaneseq (!%p312_p2) }
   0x6   : > { %315 = sbr.rel (%p312_p2) target bundleno = 2040 (0x7f8), region = 60  ;;  %v2114_v5 = vpack.i.bf16 (!%p312_p2), %v388_v3, %v387_v2  ;;  %v390_v6 = vld [vmem:[%s2436_s3 + $0x18] sm:$0xff] (!%p312_p2)  ;;  %v2053_v14 = vpack.c.bf16 (!%p312_p2), %v388_v3, %v387_v2  ;;  %v2147_v17 = vmov (!%p312_p2), 0.0|0.0   ;;  %vm2148_vm1 = vmmov (!%p312_p2), 0   ;;  %v1857_v25 = vld [vmem:[%s2437_s4] ss:$0 sm:$0xff] (!%p312_p2) }
   0x7   : > { %v2119_v7 = vpack.i.bf16 (!%p312_p2), %v390_v6, %v389_v4  ;;  %2052 = vmatprep.subr.bf16.mxu0 (!%p312_p2), %v2147_v17  ;;  %2058 = vmatprep.subr.bf16.mxu1 (!%p312_p2), %v2147_v17  ;;  %v2056_v18 = vpack.c.bf16 (!%p312_p2), %v390_v6, %v389_v4  ;;  %v2149_v19 = vmov (!%p312_p2), 0.0   ;;  %v2261_v27 = vshrl.u32 (!%p312_p2), %v641_v26, 7  ;;  %v1855_v38 = vld [vmem:[%s2434_s1] ss:$0 sm:$0xff] (!%p312_p2)  ;;  %s2152_s19 = smov (!%p312_p2), 112   ;;  %s2153_s22 = smov (!%p312_p2), 16  }
   0x8   : > { %2115 = vrot.lane.b32.xlu1 (!%p312_p2), %v2114_v5, %s2146_s27  ;;  %2054 = vmatpush3.bf16.msra.mxu0 (!%p312_p2), %v2053_v14  ;;  %v2264_v31 = vand.u32 (!%p312_p2), 127, %v641_v26  ;;  %v1856_v41 = vld [vmem:[%s2435_s2] ss:$0 sm:$0xff] (!%p312_p2)  ;;  %v2150_v44 = vmov (!%p312_p2), 1.0   ;;  %vm2151_vm5 = vmmov (!%p312_p2), 1   ;;  %vm664_vm7 = vcmask (!%p312_p2), 130048  }
   0x9   : > { %1945 = vmatprep.mubr.msk.f32.mxu0 (!%p312_p2), %vm2148_vm1, %v2149_v19  ;;  %2055 = vmatprep.subr.bf16.mxu0 (!%p312_p2), %v2147_v17  ;;  %v643_v30 = vadd.s32 (!%p312_p2), 8, %v2261_v27  ;;  %v560_v47 = vld [vmem:[%s2442_s9] sm:$0xf] (!%p312_p2)  ;;  %vm970_vm8 = vcmask (!%p312_p2), 31744   ;;  %vm966_vm10 = vcmask (!%p312_p2), 64512   ;;  %vm993_vm11 = vcmask (!%p312_p2), 1043456  }
   0xa   : > { %1956 = vmatprep.mubr.msk.f32.mxu1 (!%p312_p2), %vm2148_vm1, %v2149_v19  ;;  %v646_v33 = vadd.s32 (!%p312_p2), 8, %v2264_v31  ;;  %v634_v58 = vld [vmem:[%s2440_s7] sm:$0xff] (!%p312_p2)  ;;  %vm658_vm9 = vcmp.le.s32.totalorder (!%p312_p2), %v2264_v31, %v2261_v27  ;;  %s2155_s25 = smov (!%p312_p2), 80  }
   0xb   : > { %v651_v34 = vadd.s32 (!%p312_p2), 8, %v643_v30  ;;  %vm652_vm4 = vcmp.eq.s32.totalorder (!%p312_p2), %v643_v30, %v2264_v31  ;;  %v635_v59 = vld [vmem:[%s2441_s8] sm:$0xff] (!%p312_p2) }
   0xc   : > { %2120 = vrot.lane.b32.xlu1 (!%p312_p2), %v2119_v7, %s2146_s27  ;;  %2057 = vmatpush3.bf16.msra.mxu0 (!%p312_p2), %v2056_v18  ;;  %vm648_vm2 = vcmp.eq.s32.totalorder (!%p312_p2), %v643_v30, %v646_v33  ;;  %vm2277_vm6 = vmpackc.low (!%p312_p2), %vm2151_vm5, %vm652_vm4 }
   0xd   : > { %s2447_s14 = smov (!%p347_p3, %s1848_s14), 1  ;;  %2064 = vmatprep.subr.bf16.mxu0 %v2147_v17  ;;  %vm653_vm3 = vcmp.eq.s32.totalorder %v651_v34, %v2264_v31  ;;  %v650_v35 = vsel %vm648_vm2, -1.0, %v2149_v19 }
   0xe   : > { %s1853_s15 = sshll.u32 %s2447_s14, 3  ;;  %v655_v36 = vsel %vm653_vm3, 1.0, %v2149_v19 }
   0xf   : > { %s350_s18 = scalar_lea.vmem %s2433_s0, %s1853_s15  ;;  %v657_v40 = vadd.f32 %v655_v36, %v650_v35  ;;  %s354_s21 = scalar_lea.vmem %s2443_s10, %s1853_s15 }
  0x10   : > { %v2227_v0 = vld [vmem:[%s350_s18] sm:$0xff] }
  0x11   : > { %v359_v1 = vsel %vm358_vm0, %v2227_v0, 0.0  ;;  %v2071_v45 = vpack.c.bf16 %v657_v40, %v2150_v44 }
  0x12   : > { %360 = vadd.xlane.f32.xlu0 %v359_v1 }
  0x7a   : > { %v2116_v13 = vpop.permute.xlu1 %2115 }
  0x7b   : > { %v2118_v15 = vunpack.i.h.bf16 %v2116_v13  ;;  %v2117_v16 = vunpack.i.l.bf16 %v2116_v13 }
  0x7d   : > { %v2059_v20 = vpack.c.bf16 %v2118_v15, %v2117_v16 }
  0x7e   : > { %v2121_v21 = vpop.permute.xlu1 %2120 }
  0x7f   : > { %v2123_v22 = vunpack.i.h.bf16 %v2121_v21  ;;  %v2122_v23 = vunpack.i.l.bf16 %v2121_v21  ;;  %2060 = vmatpush3.bf16.msra.mxu1 %v2059_v20 }
  0x80   : > { %2061 = vmatprep.subr.bf16.mxu1 %v2147_v17 }
  0x81   : > { %v2062_v24 = vpack.c.bf16 %v2123_v22, %v2122_v23  ;;  %v2154_v23 = vmov -1e+09  }
  0x83   : > { %2063 = vmatpush3.bf16.msra.mxu1 %v2062_v24 }
  0x84   : > { %2070 = vmatprep.subr.bf16.mxu1 %v2147_v17 }
  0x9f   : > { %v361_v8 = vpop.xlane.xlu0 %360 }
  0xa0   : > { %v363_v9 = vmul.f32 0.03125, %v361_v8 }
  0xa2   : > { %v364_v10 = vsub.f32 %v2227_v0, %v363_v9 }
  0xa4   : > { %v365_v11 = vmul.f32 %v364_v10, %v364_v10 }
  0xa6   : > { %v366_v12 = vsel %vm358_vm0, %v365_v11, 0.0 }
  0xa7   : > { %367 = vadd.xlane.f32.xlu0 %v366_v12 }
  0xbd   : > { %487 = vrot.lane.b32.xlu0 %v1857_v25, %s2146_s27 }
 0x134   : > { %v368_v28 = vpop.xlane.xlu0 %367 }
 0x135   : > { %v369_v29 = vmul.f32 0.03125, %v368_v28 }
 0x137   : > { %v370_v32 = vadd.f32 1e-05, %v369_v29 }
 0x138   : > { %v488_v53 = vpop.permute.xlu0 %487 }
 0x139   : > { %2124 = vrsqrt.f32 %v370_v32 }
 0x143   : > { %v2125_v37 = vpop.eup %2124 }
 0x144   : > { %v372_v39 = vmul.f32 %v2125_v37, %v364_v10 }
 0x146   : > { %v379_v42 = vmul.f32 %v1855_v38, %v372_v39 }
 0x148   : > { %v386_v43 = vadd.f32 %v1856_v41, %v379_v42 }
 0x14a   : > { %1946 = vmatmul.mubr.msk.f32.vlgmr.msra.gmra.mrb[0].mxu0 %vm358_vm0, %v386_v43  ;;  %1957 = vmatmul.mubr.msk.f32.vlgmr.msra.gmra.mrb[0].mxu1 %vm358_vm0, %v386_v43 }
 0x14b   : > { %2066 = vmatpush3.bf16.msra.mxu0 %v2059_v20  ;;  %1967 = vmatprep.mubr.msk.f32.mxu0 %vm2148_vm1, %v2149_v19 }
 0x14c   : > { %2067 = vmatprep.subr.bf16.mxu0 %v2147_v17  ;;  %2073 = vmatpush3.bf16.msk.msra.mxu1 %vm2277_vm6, %v2071_v45 }
 0x14d   : > { %1974 = vmatprep.mubr.msk.f32.mxu1 %vm2148_vm1, %v2149_v19  ;;  %2074 = vmatprep.subr.bf16.mxu1 %v2147_v17 }
 0x14f   : > { %2069 = vmatpush3.bf16.msra.mxu0 %v2062_v24  ;;  %v662_v24 = vsel %vm658_vm9, 0.0, %v2154_v23 }
 0x150   : > { %1984 = vmatprep.subr.mxu0 %v2149_v19 }
 0x152   : > { %1968 = vmatmul.mubr.msk.f32.vlgmr.msra.gmra.mrb[2].mxu0 %vm358_vm0, %v560_v47 }
 0x153   : > { %1986 = vmatprep.mubr.msk.f32.mxu0 %vm2148_vm1, %v2149_v19 }
 0x21d   : > { %v467_v48 = vpop.f32.mrb[0].mxu0  ;;  %v556_v49 = vpop.f32.mrb[0].mxu1 }
 0x21e   : > { %v2298_v50 = vadd.f32 %v1857_v25, %v467_v48  ;;  %v1947_v51 = vpop.f32.mrb[1].mxu0  ;;  %v1958_v52 = vpop.f32.mrb[1].mxu1  ;;  %v2308_v54 = vadd.f32 %v556_v49, %v488_v53 }
 0x220   : > { %1149 = vrot.lane.b32.xlu1 %v2298_v50, %s2152_s19  ;;  %1975 = vmatmul.mubr.msk.f32.vlgmr.msra.gmra.mrb[2].mxu1 %vm664_vm7, %v2298_v50  ;;  %v663_v61 = vmul.f32 %v634_v58, %v2298_v50  ;;  %v741_v3 = vmul.f32 %v634_v58, %v2308_v54 }
 0x221   : > { %2077 = vmatpush3.bf16.msk.msra.mxu1 %vm2277_vm6, %v2071_v45  ;;  %1981 = vmatprep.mubr.msk.f32.mxu1 %vm2148_vm1, %v2149_v19 }
 0x222   : > { %1989 = vmatprep.subr.mxu1 %v2149_v19 }
 0x224   : > { %1231 = vrot.lane.b32.xlu1 %v2308_v54, %s2152_s19  ;;  %1982 = vmatmul.mubr.msk.f32.vlgmr.msra.gmra.mrb[4].mxu1 %vm664_vm7, %v2308_v54 }
 0x225   : > { %v630_v55 = vpop.f32.mrb[2].mxu0  ;;  %1991 = vmatprep.mubr.msk.f32.mxu1 %vm2148_vm1, %v2149_v19 }
 0x226   : > { %v2317_v56 = vadd.f32 %v630_v55, %v488_v53  ;;  %v1969_v57 = vpop.f32.mrb[3].mxu0 }
 0x228   : > { %1145 = vrot.lane.b32.xlu1 %v634_v58, %s2153_s22 }
 0x22a   : > { %1990 = vmatpush3.xpose.msk.msra.mxu1 %vm664_vm7, %v2317_v56 }
 0x22b   : > { %2078 = vmatprep.subr.bf16.mxu1 %v2147_v17 }
 0x292   : > { %v1150_v8 = vpop.permute.xlu1 %1149 }
 0x296   : > { %v1232_v9 = vpop.permute.xlu1 %1231 }
 0x29a   : > { %v1146_v28 = vpop.permute.xlu1 %1145 }
 0x29b   : > { %v1148_v30 = vmul.f32 %v1146_v28, %v2298_v50  ;;  %v1230_v32 = vmul.f32 %v1146_v28, %v2308_v54 }
 0x2f3   : > { %v734_v60 = vpop.f32.mrb[2].mxu1 }
 0x2f4   : > { %v738_v62 = vmul.f32 %v734_v60, %v635_v59  ;;  %v1976_v63 = vpop.f32.mrb[3].mxu1 }
 0x2f6   : > { %v739_v1 = vadd.f32 %v738_v62, %v663_v61 }
 0x2f7   : > { %v811_v2 = vpop.f32.mrb[4].mxu1 }
 0x2f8   : > { %v740_v4 = vmul.f32 0.25, %v739_v1  ;;  %v815_v5 = vmul.f32 %v811_v2, %v635_v59  ;;  %v1983_v6 = vpop.f32.mrb[5].mxu1 }
 0x2fa   : > { %v816_v7 = vadd.f32 %v815_v5, %v741_v3  ;;  %1992 = vmatmul.mubr.msk.f32.vlgmr.msra.gmra.mrb[6].mxu1 %vm664_vm7, %v740_v4 }
 0x2fb   : > { %2081 = vmatpush3.bf16.msk.msra.mxu1 %vm2277_vm6, %v2071_v45  ;;  %2008 = vmatprep.mubr.msk.f32.mxu1 %vm2148_vm1, %v2149_v19 }
 0x2fc   : > { %1985 = vmatpush3.xpose.msk.msra.mxu0 %vm664_vm7, %v816_v7  ;;  %2082 = vmatprep.subr.bf16.mxu1 %v2147_v17 }
 0x2fd   : > { %1994 = vmatprep.subr.mxu0 %v2149_v19 }
 0x2fe   : > { %2009 = vmatmul.mubr.msk.f32.vlgmr.msra.gmra.mrb[8].mxu1 %vm664_vm7, %v1150_v8 }
 0x2ff   : > { %2085 = vmatpush3.bf16.msk.msra.mxu1 %vm2277_vm6, %v2071_v45  ;;  %1987 = vmatmul.mubr.msk.f32.vlgmr.msra.gmra.mrb[4].mxu0 %vm664_vm7, %v740_v4 }
 0x300   : > { %2015 = vmatprep.mubr.msk.f32.mxu1 %vm2148_vm1, %v2149_v19  ;;  %2023 = vmatprep.subr.mxu1 %v2149_v19 }
 0x301   : > { %1996 = vmatprep.mubr.msk.f32.mxu0 %vm2148_vm1, %v2149_v19 }
 0x302   : > { %2016 = vmatmul.mubr.msk.f32.vlgmr.msra.gmra.mrb[10].mxu1 %vm664_vm7, %v1232_v9 }
 0x303   : > { %2025 = vmatprep.mubr.msk.f32.mxu1 %vm2148_vm1, %v2149_v19 }
 0x3cd   : > { %v962_v10 = vpop.f32.mrb[6].mxu1 }
 0x3ce   : > { %v1993_v11 = vpop.f32.mrb[7].mxu1  ;;  %v971_v12 = vsel %vm970_vm8, %v962_v10, -inf }
 0x3cf   : > { %972 = vmax.xlane.f32.xlu0 %v971_v12  ;;  %v639_v11 = vld [vmem:[%s2438_s5 + $0x18] sm:$0xff] }
 0x3d1   : > { %v1219_v13 = vpop.f32.mrb[8].mxu1 }
 0x3d2   : > { %v1223_v14 = vmul.f32 %v1219_v13, %v635_v59  ;;  %v889_v15 = vpop.f32.mrb[4].mxu0  ;;  %v2010_v16 = vpop.f32.mrb[9].mxu1 }
 0x3d3   : > { %v1988_v18 = vpop.f32.mrb[5].mxu0  ;;  %v890_v25 = vadd.f32 %v889_v15, %v662_v24 }
 0x3d4   : > { %1225 = vrot.lane.b32.xlu1 %v1223_v14, %s2153_s22 }
 0x3d5   : > { %v1301_v20 = vpop.f32.mrb[10].mxu1  ;;  %v967_v26 = vsel %vm966_vm10, %v890_v25, -inf }
 0x3d6   : > { %v1305_v21 = vmul.f32 %v1301_v20, %v635_v59  ;;  %v2017_v22 = vpop.f32.mrb[11].mxu1 }
 0x3d7   : > { %v637_v22 = vld [vmem:[%s2438_s5 + $0x8] sm:$0xff] }
 0x3d8   : > { %1307 = vrot.lane.b32.xlu1 %v1305_v21, %s2153_s22  ;;  %v636_v21 = vld [vmem:[%s2438_s5] sm:$0xff] }
 0x3e5   : > { %988 = vrot.lane.b32.xlu0 %v2317_v56, %s2146_s27 }
 0x3e9   : > { %1391 = vrot.lane.b32.xlu0 %v2317_v56, %s2152_s19 }
 0x3fc   : > { %968 = vmax.xlane.f32.xlu1 %v967_v26 }
 0x40d   : > { %1066 = vrot.lane.b32.xlu1 %v2308_v54, %s2146_s27 }
 0x446   : > { %v1226_v29 = vpop.permute.xlu1 %1225 }
 0x447   : > { %v1228_v34 = vadd.f32 %v1226_v29, %v1148_v30 }
 0x449   : > { %v1229_v27 = vmul.f32 0.25, %v1228_v34 }
 0x44a   : > { %v1308_v33 = vpop.permute.xlu1 %1307 }
 0x44b   : > { %v1310_v35 = vadd.f32 %v1308_v33, %v1230_v32  ;;  %v1885_v33 = vld [vmem:[%s2439_s6] ss:$0 sm:$0xff] }
 0x44d   : > { %1315 = vrot.lane.b32.xlu1 %v1310_v35, %s2152_s19 }
 0x451   : > { %1312 = vrot.lane.b32.xlu1 %v1229_v27, %s2152_s19 }
 0x45c   : > { %v973_v31 = vpop.xlane.xlu0 %972 }
 0x460   : > { %v989_v36 = vpop.permute.xlu0 %988 }
 0x461   : > { %1995 = vmatpush3.msk.msra.mxu0 %vm993_vm11, %v989_v36 }
 0x462   : > { %1999 = vmatprep.subr.mxu0 %v2149_v19 }
 0x464   : > { %v1392_v37 = vpop.permute.xlu0 %1391 }
 0x465   : > { %2024 = vmatpush3.xpose.msk.msra.mxu1 %vm664_vm7, %v1392_v37 }
 0x466   : > { %2086 = vmatprep.subr.bf16.mxu1 %v2147_v17 }
 0x489   : > { %v969_v38 = vpop.xlane.xlu1 %968 }
 0x48a   : > { %v974_v39 = vmax.f32 %v969_v38, %v973_v31 }
 0x48c   : > { %v978_v40 = vsub.f32 %v962_v10, %v974_v39  ;;  %v975_v42 = vsub.f32 %v890_v25, %v974_v39  ;;  %v638_v10 = vld [vmem:[%s2438_s5 + $0x10] sm:$0xff]  ;;  %v2090_v25 = vpack.c.bf16 %v637_v22, %v636_v21 }
 0x48d   : > { %v1067_v45 = vpop.permute.xlu1 %1066  ;;  %v2087_v12 = vpack.c.bf16 %v639_v11, %v638_v10 }
 0x48e   : > { %v979_v41 = vmul.f32 1.442695, %v978_v40  ;;  %v976_v43 = vmul.f32 1.442695, %v975_v42 }
 0x490   : > { %2126 = vpow2.f32 %v979_v41 }
 0x491   : > { %2128 = vpow2.f32 %v976_v43 }
 0x49a   : > { %v2127_v44 = vpop.eup %2126 }
 0x49b   : > { %1997 = vmatmul.mubr.msk.f32.vlgmr.msra.gmra.mrb[6].mxu0 %vm970_vm8, %v2127_v44  ;;  %v2129_v46 = vpop.eup %2128  ;;  %v984_v9 = vsel %vm970_vm8, %v2127_v44, 0.0 }
 0x49c   : > { %2000 = vmatpush3.msra.mxu0 %v1067_v45  ;;  %2001 = vmatprep.mubr.msk.f32.mxu0 %vm2148_vm1, %v2149_v19  ;;  %v981_v8 = vsel %vm966_vm10, %v2129_v46, 0.0 }
 0x49d   : > { %2018 = vmatprep.subr.mxu0 %v2149_v19 }
 0x4a3   : > { %2002 = vmatmul.mubr.msk.f32.vlgmr.msra.gmra.mrb[6].mxu0 %vm966_vm10, %v2129_v46 }
 0x4a4   : > { %2020 = vmatprep.mubr.msk.f32.mxu0 %vm2148_vm1, %v2149_v19 }
 0x4bf   : > { %v1316_v47 = vpop.permute.xlu1 %1315 }
 0x4c0   : > { %2019 = vmatpush3.xpose.msk.msra.mxu0 %vm664_vm7, %v1316_v47 }
 0x4c1   : > { %2028 = vmatprep.subr.mxu0 %v2149_v19 }
 0x4c3   : > { %v1313_v48 = vpop.permute.xlu1 %1312 }
 0x4c4   : > { %2021 = vmatmul.mubr.msk.f32.vlgmr.msra.gmra.mrb[8].mxu0 %vm664_vm7, %v1313_v48  ;;  %2026 = vmatmul.mubr.msk.f32.vlgmr.msra.gmra.mrb[12].mxu1 %vm664_vm7, %v1313_v48 }
 0x4c5   : > { %2030 = vmatprep.mubr.msk.f32.mxu0 %vm2148_vm1, %v2149_v19  ;;  %2042 = vmatprep.mubr.msk.f32.mxu1 %vm2148_vm1, %v2149_v19 }
 0x4c6   : > { %2088 = vmatpush3.bf16.msra.mxu1 %v2087_v12 }
 0x4c7   : > { %2089 = vmatprep.subr.bf16.mxu1 %v2147_v17 }
 0x576   : > { %v2386_v49 = vpop.f32.mrb[6].mxu0 }
 0x577   : > { %v2003_v50 = vpop.f32.mrb[7].mxu0 }
 0x597   : > { %v1387_v51 = vpop.f32.mrb[8].mxu0  ;;  %v1461_v52 = vpop.f32.mrb[12].mxu1 }
 0x598   : > { %v1388_v53 = vadd.f32 %v1387_v51, %v662_v24  ;;  %v2022_v55 = vpop.f32.mrb[9].mxu0  ;;  %v2027_v57 = vpop.f32.mrb[13].mxu1  ;;  %v1468_v58 = vsel %vm970_vm8, %v1461_v52, -inf }
 0x599   : > { %1469 = vmax.xlane.f32.xlu1 %v1468_v58 }
 0x59a   : > { %v1465_v59 = vsel %vm966_vm10, %v1388_v53, -inf }
 0x59b   : > { %1466 = vmax.xlane.f32.xlu0 %v1465_v59 }
 0x5aa   : > { %1562 = vrot.lane.b32.xlu1 %v2308_v54, %s2155_s25 }
 0x5b1   : > { %1485 = vrot.lane.b32.xlu0 %v2317_v56, %s2155_s25 }
 0x626   : > { %v1470_v60 = vpop.xlane.xlu1 %1469 }
 0x628   : > { %v1467_v61 = vpop.xlane.xlu0 %1466 }
 0x629   : > { %v1471_v62 = vmax.f32 %v1467_v61, %v1470_v60 }
 0x62a   : > { %v1563_v7 = vpop.permute.xlu1 %1562 }
 0x62b   : > { %v1472_v63 = vsub.f32 %v1388_v53, %v1471_v62  ;;  %v1475_v1 = vsub.f32 %v1461_v52, %v1471_v62 }
 0x62c   : > { %v1486_v2 = vpop.permute.xlu0 %1485 }
 0x62d   : > { %v1473_v3 = vmul.f32 1.442695, %v1472_v63  ;;  %v1476_v4 = vmul.f32 1.442695, %v1475_v1  ;;  %2029 = vmatpush3.msk.msra.mxu0 %vm993_vm11, %v1486_v2 }
 0x62e   : > { %2033 = vmatprep.subr.mxu0 %v2149_v19 }
 0x62f   : > { %2130 = vpow2.f32 %v1473_v3 }
 0x630   : > { %2132 = vpow2.f32 %v1476_v4 }
 0x639   : > { %v2131_v5 = vpop.eup %2130 }
 0x63a   : > { %v2133_v6 = vpop.eup %2132  ;;  %v1478_v54 = vsel %vm966_vm10, %v2131_v5, 0.0 }
 0x63b   : > { %2031 = vmatmul.mubr.msk.f32.vlgmr.msra.gmra.mrb[10].mxu0 %vm970_vm8, %v2133_v6  ;;  %v1481_v56 = vsel %vm970_vm8, %v2133_v6, 0.0  ;;  %1479 = vadd.xlane.f32.xlu0 %v1478_v54 }
 0x63c   : > { %2034 = vmatpush3.msra.mxu0 %v1563_v7  ;;  %1482 = vadd.xlane.f32.xlu1 %v1481_v56 }
 0x63d   : > { %2035 = vmatprep.mubr.msk.f32.mxu0 %vm2148_vm1, %v2149_v19 }
 0x63f   : > { %982 = vadd.xlane.f32.xlu0 %v981_v8 }
 0x643   : > { %2036 = vmatmul.mubr.msk.f32.vlgmr.msra.gmra.mrb[10].mxu0 %vm966_vm10, %v2131_v5  ;;  %985 = vadd.xlane.f32.xlu0 %v984_v9 }
 0x6c8   : > { %v1480_v13 = vpop.xlane.xlu0 %1479 }
 0x6c9   : > { %v1483_v15 = vpop.xlane.xlu1 %1482 }
 0x6ca   : > { %v1484_v18 = vadd.f32 %v1483_v15, %v1480_v13 }
 0x6cc   : > { %v983_v14 = vpop.xlane.xlu0 %982  ;;  %2134 = vrcp.f32 %v1484_v18 }
 0x6d0   : > { %v986_v16 = vpop.xlane.xlu0 %985 }
 0x6d1   : > { %v987_v20 = vadd.f32 %v986_v16, %v983_v14 }
 0x6d3   : > { %2136 = vrcp.f32 %v987_v20 }
 0x6d6   : > { %v2135_v23 = vpop.eup %2134 }
 0x6dd   : > { %v2137_v28 = vpop.eup %2136 }
 0x6de   : > { %v1143_v29 = vmul.f32 %v2137_v28, %v2386_v49 }
 0x716   : > { %v1634_v24 = vpop.f32.mrb[10].mxu0 }
 0x717   : > { %v1639_v17 = vmul.f32 %v2135_v23, %v1634_v24  ;;  %v2037_v26 = vpop.f32.mrb[11].mxu0 }
 0x719   : > { %2043 = vmatmul.mubr.msk.f32.vlgmr.msra.gmra.mrb[14].mxu1 %vm664_vm7, %v1639_v17 }
 0x71a   : > { %2091 = vmatpush3.bf16.msra.mxu1 %v2090_v25  ;;  %2049 = vmatprep.mubr.msk.f32.mxu1 %vm2148_vm1, %v2149_v19 }
 0x71d   : > { %2050 = vmatmul.mubr.msk.f32.vlgmr.msra.gmra.mrb[16].mxu1 %vm664_vm7, %v1143_v29 }
 0x7ec   : > { %v1709_v30 = vpop.f32.mrb[14].mxu1 }
 0x7ed   : > { %v2044_v32 = vpop.f32.mrb[15].mxu1 }
 0x7f0   : > { %v1782_v34 = vpop.f32.mrb[16].mxu1 }
 0x7f1   : > { %v1783_v35 = vadd.f32 %v1782_v34, %v1709_v30  ;;  %v2051_v27 = vpop.f32.mrb[17].mxu1 }
 0x7f3   : > { %v1792_v31 = vadd.f32 %v1885_v33, %v1783_v35 }
 0x7f5   : > { %v1793_v19 = vadd.f32 %v1792_v31, %v2227_v0 }
 0x7f7   : > { %1794 = vst.msk [vmem:[%s354_s21] sm:$0xff] %vm358_vm0, %v1793_v19 }
 0x7f8 PF: > { %s20_s13 = sadd.s32 1, %s2144_s13  }
 0x7f9   : > { %p17_p4 = scmp.ge.s32.totalorder %s20_s13, 4  }
 0x7fb   :  { %19 = sbr.rel (!%p17_p4) target bundleno = 1 (0x1), region = 90 }

</bundles_post_ra>
